<compile_context>
chip_gen: v7x
topology: tpu7x:2x2x1
jax: 0.10.0
libtpu: 0.0.40
codegen_flags: <defaults>
</compile_context>

<pallas_src>
import jax
import jax.numpy as jnp
from jax import lax
from jax.experimental import pallas as pl
from jax.experimental.pallas import tpu as pltpu

# ---------------- configuration (small synthetic shapes) ----------------
NS = 2                    # batch (folded onto lanes inside the kernel)
H = 16                    # height
W = 16                    # width
PLANES = 8                # "planes"
INPLANES = PLANES * 4     # 32 (module asserts inplanes == planes * 4)
GROUPS = 4                # GroupBatchnorm2d group_num
EPS = 1e-10               # GroupBatchnorm2d eps (added to std, not var)
NEG_SLOPE = 0.2           # LeakyReLU(0.2)
HW = H * W                # 256 per sample (2 x 128 lanes)
LANES = NS * HW           # 512 folded lane axis

N_EL_P = float((PLANES // GROUPS) * HW)     # elements per group (C = PLANES)
N_EL_I = float((INPLANES // GROUPS) * HW)   # elements per group (C = INPLANES)

AFF_ROWS = 4 * PLANES + 2 * INPLANES        # 96 packed affine rows
GAVG_ROWS = INPLANES + PLANES               # 40 packed group-avg rows


# ---------------- in-kernel helpers ----------------
def _leaky_relu(x):
    # slope in (0,1) => max(x, slope*x) == leaky_relu(x); 2 VPU ops per vreg
    return jnp.maximum(x, NEG_SLOPE * x)


def _gbn(x, bavg, gamma, beta, n_el):
    """GroupBatchnorm2d on the folded (C, NS*HW) tile, fused to scale/bias.

    Per-sample stats come from static 256-lane slices (128-lane aligned).
    bavg: (C, C) block-diagonal group-averaging matrix (1/(cpg*HW) inside a
    channel group).  gamma/beta: (C, 1).
    """
    cols = []
    for s in range(NS):
        xs = x[:, s * HW:(s + 1) * HW]
        cols.append(jnp.sum(xs, axis=1, keepdims=True))        # (C,1) lane reduce
        cols.append(jnp.sum(xs * xs, axis=1, keepdims=True))   # (C,1)
    st = jnp.concatenate(cols, axis=1)                          # (C, 2*NS)
    g = jnp.dot(bavg, st, preferred_element_type=jnp.float32)   # (C, 2*NS)
    unbias = n_el / (n_el - 1.0)                                # torch.std ddof=1
    outs = []
    for s in range(NS):
        mean = g[:, 2 * s:2 * s + 1]
        ex2 = g[:, 2 * s + 1:2 * s + 2]
        # Single-pass variance is fine at these magnitudes (see review notes).
        var = (ex2 - mean * mean) * unbias
        # 1/(std+EPS) with EPS=1e-10 is below f32 ulp of any realistic std ->
        # one EUP rsqrt replaces sqrt + approx-recip + Newton step.
        inv = lax.rsqrt(jnp.maximum(var, EPS * EPS))
        scale = gamma * inv                                     # (C, 1)
        bias = beta - mean * scale                              # (C, 1)
        outs.append(x[:, s * HW:(s + 1) * HW] * scale + bias)
    return jnp.concatenate(outs, axis=1)                        # (C, NS*HW)


# ---------------- the Pallas kernel (whole batch in one step) ----------------
def bottleneck_kernel(x_ref, w1_ref, w2_ref, w3_ref, aff_ref, gavg_ref,
                      mask_ref, o_ref, cat_ref):
    f32 = jnp.float32

    # Fold batch onto lanes: (NS, 4P, HW) -> (4P, NS*HW) = (32, 512).
    x = jnp.concatenate([x_ref[s].astype(f32) for s in range(NS)], axis=1)

    # Unpack affine params (all slices sublane-aligned, multiples of 8).
    g1 = aff_ref[0 * PLANES:1 * PLANES, :]
    b1 = aff_ref[1 * PLANES:2 * PLANES, :]
    g2 = aff_ref[2 * PLANES:3 * PLANES, :]
    b2 = aff_ref[3 * PLANES:4 * PLANES, :]
    g3 = aff_ref[4 * PLANES:4 * PLANES + INPLANES, :]
    b3 = aff_ref[4 * PLANES + INPLANES:4 * PLANES + 2 * INPLANES, :]

    # Unpack packed group-averaging matrices.
    bi = gavg_ref[0:INPLANES, :]                                  # (32, 32)
    bp = gavg_ref[INPLANES:INPLANES + PLANES, 0:PLANES]           # (8, 8)

    # conv1: 1x1 conv == (P, 4P) @ (4P, NS*HW)
    a = jnp.dot(w1_ref[...], x, preferred_element_type=f32)       # (8, 512)
    a = _leaky_relu(_gbn(a, bp, g1, b1, N_EL_P))

    # conv2: 3x3, dilation=2, padding=2 as ONE im2col matmul.
    # tap(kh,kw) = lane roll of the folded (s,h,w) axis by -(dh*W+dw) (mod 512)
    # times a precomputed boundary mask (also zeroes cross-sample wrap lanes).
    for k in range(9):
        kh, kw = k // 3, k % 3
        dh, dw = 2 * (kh - 1), 2 * (kw - 1)
        off = dh * W + dw
        t = a if off == 0 else pltpu.roll(a, shift=(-off) % LANES, axis=1)
        cat_ref[k * PLANES:(k + 1) * PLANES, :] = (
            t * mask_ref[k * PLANES:(k + 1) * PLANES, :])
    b = jnp.dot(w2_ref[...], cat_ref[...],
                preferred_element_type=f32)                       # (8,72)@(72,512)
    b = _leaky_relu(_gbn(b, bp, g2, b2, N_EL_P))

    # conv3: 1x1 conv == (4P, P) @ (P, NS*HW)
    c = jnp.dot(w3_ref[...], b, preferred_element_type=f32)       # (32, 512)
    c = _gbn(c, bi, g3, b3, N_EL_I)

    # residual add + final activation, stored per sample (lane-dense 256-wide).
    for s in range(NS):
        res = x_ref[s].astype(f32)
        o_ref[s] = _leaky_relu(c[:, s * HW:(s + 1) * HW] + res).astype(o_ref.dtype)


# ---------------- wrapper-side constant builders ----------------
def _group_avg_matrix(c, groups, hw):
    cpg = c // groups
    ch = jnp.arange(c)
    same = (ch[:, None] // cpg) == (ch[None, :] // cpg)
    return same.astype(jnp.float32) / float(cpg * hw)


def _conv2_boundary_mask():
    """(9*PLANES, NS*HW) 0/1 mask for the dilated 3x3 taps (hoisted constant)."""
    hh = jnp.arange(H)[:, None]
    ww = jnp.arange(W)[None, :]
    rows = []
    for kh in range(3):
        dh = 2 * (kh - 1)
        for kw in range(3):
            dw = 2 * (kw - 1)
            valid = ((hh + dh >= 0) & (hh + dh < H) &
                     (ww + dw >= 0) & (ww + dw < W)).astype(jnp.float32)   # (H, W)
            lane = jnp.tile(valid.reshape(1, HW), (1, NS))                 # (1, 512)
            rows.append(jnp.broadcast_to(lane, (PLANES, NS * HW)))
    return jnp.concatenate(rows, axis=0)                                   # (72, 512)


# ---------------- wrapper ----------------
def bottleneck_forward(x_nchw, params):
    w1, g1, b1, w2, g2, b2, w3, g3, b3 = params
    n = x_nchw.shape[0]
    assert n == NS

    # (N, C, H, W) -> (N, C, HW): free reshape (no transpose); channels land on
    # sublanes, each sample's 256-wide spatial axis on lanes.
    x = x_nchw.reshape(n, INPLANES, HW)

    # conv2 weight (O, I, 3, 3) -> (O, 9*I) matching the in-kernel tap order.
    w2f = jnp.transpose(w2, (0, 2, 3, 1)).reshape(PLANES, 9 * PLANES)

    # Packed per-channel affine params: one (96, 1) input instead of six.
    aff = jnp.concatenate([g1, b1, g2, b2, g3, b3]).reshape(AFF_ROWS, 1)

    # Packed block-diagonal group-average matrices: one (40, 32) input.
    bi = _group_avg_matrix(INPLANES, GROUPS, HW)                  # (32, 32)
    bp = _group_avg_matrix(PLANES, GROUPS, HW)                    # (8, 8)
    bp_pad = jnp.pad(bp, ((0, 0), (0, INPLANES - PLANES)))        # (8, 32)
    gavg = jnp.concatenate([bi, bp_pad], axis=0)                  # (40, 32)

    # Precomputed im2col boundary mask (grid-invariant constant).
    mask = _conv2_boundary_mask()                                 # (72, 512)

    out = pl.pallas_call(
        bottleneck_kernel,
        out_shape=jax.ShapeDtypeStruct((n, INPLANES, HW), x_nchw.dtype),
        grid_spec=pltpu.PrefetchScalarGridSpec(
            num_scalar_prefetch=0,
            grid=(1,),                                            # whole batch in one step
            in_specs=[
                pl.BlockSpec((n, INPLANES, HW), lambda i: (0, 0, 0)),        # x (2,32,256)
                pl.BlockSpec((PLANES, INPLANES), lambda i: (0, 0)),          # w1 (8,32)
                pl.BlockSpec((PLANES, 9 * PLANES), lambda i: (0, 0)),        # w2 im2col (8,72)
                pl.BlockSpec((INPLANES, PLANES), lambda i: (0, 0)),          # w3 (32,8)
                pl.BlockSpec((AFF_ROWS, 1), lambda i: (0, 0)),               # packed gammas/betas
                pl.BlockSpec((GAVG_ROWS, INPLANES), lambda i: (0, 0)),       # packed group-avg mats
                pl.BlockSpec((9 * PLANES, NS * HW), lambda i: (0, 0)),       # boundary mask (72,512)
            ],
            out_specs=pl.BlockSpec((n, INPLANES, HW), lambda i: (0, 0, 0)),
            scratch_shapes=[pltpu.VMEM((9 * PLANES, NS * HW), jnp.float32)],  # im2col tile
        ),
        compiler_params=pltpu.CompilerParams(dimension_semantics=("arbitrary",)),
    )(x, w1, w2f, w3, aff, gavg, mask)

    return out.reshape(n, INPLANES, H, W)


# ---------------- pure-JAX reference (for a correctness check) ----------------
def reference_forward(x_nchw, params):
    w1, g1, b1, w2, g2, b2, w3, g3, b3 = params

    def gbn(x, gamma, beta):
        n_, c_, h_, w_ = x.shape
        xg = x.reshape(n_, GROUPS, -1)
        mean = xg.mean(axis=2, keepdims=True)
        std = jnp.std(xg, axis=2, keepdims=True, ddof=1)   # unbiased, as torch.std
        xg = (xg - mean) / (std + EPS)
        xr = xg.reshape(n_, c_, h_, w_)
        return xr * gamma.reshape(1, -1, 1, 1) + beta.reshape(1, -1, 1, 1)

    def lrelu(v):
        return jnp.where(v > 0, v, NEG_SLOPE * v)

    a = jnp.einsum('nchw,oc->nohw', x_nchw, w1)
    a = lrelu(gbn(a, g1, b1))
    b = jax.lax.conv_general_dilated(
        a, w2, window_strides=(1, 1), padding=((2, 2), (2, 2)),
        rhs_dilation=(2, 2), dimension_numbers=('NCHW', 'OIHW', 'NCHW'))
    b = lrelu(gbn(b, g2, b2))
    c = jnp.einsum('nchw,oc->nohw', b, w3)
    c = gbn(c, g3, b3)
    return lrelu(c + x_nchw)


if __name__ == "__main__":
    key = jax.random.PRNGKey(0)
    keys = jax.random.split(key, 10)

    x = jax.random.normal(keys[0], (NS, INPLANES, H, W), dtype=jnp.float32)  # NCHW

    # Deterministic parameter init (conv weights random, GBN affine near identity).
    w1 = 0.1 * jax.random.normal(keys[1], (PLANES, INPLANES), dtype=jnp.float32)        # conv1: (O, I)
    w2 = 0.1 * jax.random.normal(keys[2], (PLANES, PLANES, 3, 3), dtype=jnp.float32)    # conv2: OIHW
    w3 = 0.1 * jax.random.normal(keys[3], (INPLANES, PLANES), dtype=jnp.float32)        # conv3: (O, I)
    g1 = 1.0 + 0.1 * jax.random.normal(keys[4], (PLANES,), dtype=jnp.float32)
    b1 = 0.1 * jax.random.normal(keys[5], (PLANES,), dtype=jnp.float32)
    g2 = 1.0 + 0.1 * jax.random.normal(keys[6], (PLANES,), dtype=jnp.float32)
    b2 = 0.1 * jax.random.normal(keys[7], (PLANES,), dtype=jnp.float32)
    g3 = 1.0 + 0.1 * jax.random.normal(keys[8], (INPLANES,), dtype=jnp.float32)
    b3 = 0.1 * jax.random.normal(keys[9], (INPLANES,), dtype=jnp.float32)

    params = (w1, g1, b1, w2, g2, b2, w3, g3, b3)

    out = bottleneck_forward(x, params)
    out = jax.block_until_ready(out)

    ref = jax.block_until_ready(reference_forward(x, params))
    assert out.shape == (NS, INPLANES, H, W)
    assert jnp.allclose(out, ref, atol=2e-3, rtol=2e-3), float(jnp.max(jnp.abs(out - ref)))

    print("KERNEL_OK")
</pallas_src>

<mosaic_0001>
module attributes {stable_mosaic.version = 11 : i64} {
  func.func @bottleneck_kernel(%arg0: i32, %arg1: memref<2x32x256xf32, #tpu.memory_space<vmem>>, %arg2: memref<8x32xf32, #tpu.memory_space<vmem>>, %arg3: memref<8x72xf32, #tpu.memory_space<vmem>>, %arg4: memref<32x8xf32, #tpu.memory_space<vmem>>, %arg5: memref<96x1xf32, #tpu.memory_space<vmem>>, %arg6: memref<40x32xf32, #tpu.memory_space<vmem>>, %arg7: memref<72x512xf32, #tpu.memory_space<vmem>>, %arg8: memref<2x32x256xf32, #tpu.memory_space<vmem>>, %arg9: memref<72x512xf32, #tpu.memory_space<vmem>>) attributes {dimension_semantics = [#tpu.dimension_semantics<arbitrary>], iteration_bounds = array<i64: 1>, scalar_prefetch = 0 : i64, scratch_operands = 1 : i64, tpu.core_type = #tpu.core_type<tc>, window_params = [{pipeline_mode = #tpu.pipeline_mode<synchronous>, transform_indices = @transform_0, window_bounds = array<i64: 2, 32, 256>}, {pipeline_mode = #tpu.pipeline_mode<synchronous>, transform_indices = @transform_1, window_bounds = array<i64: 8, 32>}, {pipeline_mode = #tpu.pipeline_mode<synchronous>, transform_indices = @transform_2, window_bounds = array<i64: 8, 72>}, {pipeline_mode = #tpu.pipeline_mode<synchronous>, transform_indices = @transform_3, window_bounds = array<i64: 32, 8>}, {pipeline_mode = #tpu.pipeline_mode<synchronous>, transform_indices = @transform_4, window_bounds = array<i64: 96, 1>}, {pipeline_mode = #tpu.pipeline_mode<synchronous>, transform_indices = @transform_5, window_bounds = array<i64: 40, 32>}, {pipeline_mode = #tpu.pipeline_mode<synchronous>, transform_indices = @transform_6, window_bounds = array<i64: 72, 512>}, {pipeline_mode = #tpu.pipeline_mode<synchronous>, transform_indices = @transform_7, window_bounds = array<i64: 2, 32, 256>}]} {
    %c0 = arith.constant 0 : index
    %c0_0 = arith.constant 0 : index
    %c0_1 = arith.constant 0 : index
    %0 = vector.load %arg1[%c0, %c0_0, %c0_1] : memref<2x32x256xf32, #tpu.memory_space<vmem>>, vector<1x32x256xf32>
    %1 = vector.shape_cast %0 : vector<1x32x256xf32> to vector<32x256xf32>
    %c1 = arith.constant 1 : index
    %c0_2 = arith.constant 0 : index
    %c0_3 = arith.constant 0 : index
    %2 = vector.load %arg1[%c1, %c0_2, %c0_3] : memref<2x32x256xf32, #tpu.memory_space<vmem>>, vector<1x32x256xf32>
    %3 = vector.shape_cast %2 : vector<1x32x256xf32> to vector<32x256xf32>
    %4 = tpu.concatenate %1, %3 in 1 : vector<32x256xf32>, vector<32x256xf32> -> vector<32x512xf32>
    %c0_4 = arith.constant 0 : index
    %c0_5 = arith.constant 0 : index
    %5 = vector.load %arg5[%c0_4, %c0_5] : memref<96x1xf32, #tpu.memory_space<vmem>>, vector<8x1xf32>
    %c8 = arith.constant 8 : index
    %c0_6 = arith.constant 0 : index
    %6 = vector.load %arg5[%c8, %c0_6] : memref<96x1xf32, #tpu.memory_space<vmem>>, vector<8x1xf32>
    %c16 = arith.constant 16 : index
    %c0_7 = arith.constant 0 : index
    %7 = vector.load %arg5[%c16, %c0_7] : memref<96x1xf32, #tpu.memory_space<vmem>>, vector<8x1xf32>
    %c24 = arith.constant 24 : index
    %c0_8 = arith.constant 0 : index
    %8 = vector.load %arg5[%c24, %c0_8] : memref<96x1xf32, #tpu.memory_space<vmem>>, vector<8x1xf32>
    %c32 = arith.constant 32 : index
    %c0_9 = arith.constant 0 : index
    %9 = vector.load %arg5[%c32, %c0_9] : memref<96x1xf32, #tpu.memory_space<vmem>>, vector<32x1xf32>
    %c64 = arith.constant 64 : index
    %c0_10 = arith.constant 0 : index
    %10 = vector.load %arg5[%c64, %c0_10] : memref<96x1xf32, #tpu.memory_space<vmem>>, vector<32x1xf32>
    %c0_11 = arith.constant 0 : index
    %c0_12 = arith.constant 0 : index
    %11 = vector.load %arg6[%c0_11, %c0_12] : memref<40x32xf32, #tpu.memory_space<vmem>>, vector<32x32xf32>
    %c32_13 = arith.constant 32 : index
    %c0_14 = arith.constant 0 : index
    %12 = vector.load %arg6[%c32_13, %c0_14] : memref<40x32xf32, #tpu.memory_space<vmem>>, vector<8x8xf32>
    %c0_15 = arith.constant 0 : index
    %c0_16 = arith.constant 0 : index
    %13 = vector.load %arg2[%c0_15, %c0_16] : memref<8x32xf32, #tpu.memory_space<vmem>>, vector<8x32xf32>
    %cst = arith.constant dense<0.000000e+00> : vector<8x512xf32>
    %14 = tpu.matmul %13, %4, %cst {dimension_numbers = #tpu.dot_dimension_numbers<[1], [0], [0], [1], [0, 0, 1, 1], [], []>} : vector<8x32xf32>, vector<32x512xf32>, vector<8x512xf32> -> vector<8x512xf32>
    %15 = vector.extract_strided_slice %14 {offsets = [0, 0], sizes = [8, 256], strides = [1, 1]} : vector<8x512xf32> to vector<8x256xf32>
    %cst_17 = arith.constant dense<0.000000e+00> : vector<8xf32>
    %16 = vector.multi_reduction <add>, %15, %cst_17 [1] : vector<8x256xf32> to vector<8xf32>
    %17 = vector.shape_cast %16 : vector<8xf32> to vector<8x1xf32>
    %18 = arith.mulf %15, %15 : vector<8x256xf32>
    %cst_18 = arith.constant dense<0.000000e+00> : vector<8xf32>
    %19 = vector.multi_reduction <add>, %18, %cst_18 [1] : vector<8x256xf32> to vector<8xf32>
    %20 = vector.shape_cast %19 : vector<8xf32> to vector<8x1xf32>
    %21 = vector.extract_strided_slice %14 {offsets = [0, 256], sizes = [8, 256], strides = [1, 1]} : vector<8x512xf32> to vector<8x256xf32>
    %cst_19 = arith.constant dense<0.000000e+00> : vector<8xf32>
    %22 = vector.multi_reduction <add>, %21, %cst_19 [1] : vector<8x256xf32> to vector<8xf32>
    %23 = vector.shape_cast %22 : vector<8xf32> to vector<8x1xf32>
    %24 = arith.mulf %21, %21 : vector<8x256xf32>
    %cst_20 = arith.constant dense<0.000000e+00> : vector<8xf32>
    %25 = vector.multi_reduction <add>, %24, %cst_20 [1] : vector<8x256xf32> to vector<8xf32>
    %26 = vector.shape_cast %25 : vector<8xf32> to vector<8x1xf32>
    %27 = tpu.concatenate %17, %20, %23, %26 in 1 : vector<8x1xf32>, vector<8x1xf32>, vector<8x1xf32>, vector<8x1xf32> -> vector<8x4xf32>
    %cst_21 = arith.constant dense<0.000000e+00> : vector<8x4xf32>
    %28 = tpu.matmul %12, %27, %cst_21 {dimension_numbers = #tpu.dot_dimension_numbers<[1], [0], [0], [1], [0, 0, 1, 1], [], []>} : vector<8x8xf32>, vector<8x4xf32>, vector<8x4xf32> -> vector<8x4xf32>
    %29 = vector.extract_strided_slice %28 {offsets = [0, 0], sizes = [8, 1], strides = [1, 1]} : vector<8x4xf32> to vector<8x1xf32>
    %30 = vector.extract_strided_slice %28 {offsets = [0, 1], sizes = [8, 1], strides = [1, 1]} : vector<8x4xf32> to vector<8x1xf32>
    %31 = arith.mulf %29, %29 : vector<8x1xf32>
    %32 = arith.subf %30, %31 : vector<8x1xf32>
    %cst_22 = arith.constant 1.00195694 : f32
    %33 = vector.broadcast %cst_22 : f32 to vector<8x1xf32>
    %34 = arith.mulf %32, %33 : vector<8x1xf32>
    %cst_23 = arith.constant 9.99999968E-21 : f32
    %35 = vector.broadcast %cst_23 : f32 to vector<8x1xf32>
    %36 = arith.maximumf %34, %35 : vector<8x1xf32>
    %37 = math.rsqrt %36 : vector<8x1xf32>
    %38 = arith.mulf %5, %37 : vector<8x1xf32>
    %39 = arith.mulf %29, %38 : vector<8x1xf32>
    %40 = arith.subf %6, %39 : vector<8x1xf32>
    %41 = vector.extract_strided_slice %14 {offsets = [0, 0], sizes = [8, 256], strides = [1, 1]} : vector<8x512xf32> to vector<8x256xf32>
    %42 = vector.broadcast %38 : vector<8x1xf32> to vector<8x256xf32>
    %43 = arith.mulf %41, %42 : vector<8x256xf32>
    %44 = vector.broadcast %40 : vector<8x1xf32> to vector<8x256xf32>
    %45 = arith.addf %43, %44 : vector<8x256xf32>
    %46 = vector.extract_strided_slice %28 {offsets = [0, 2], sizes = [8, 1], strides = [1, 1]} : vector<8x4xf32> to vector<8x1xf32>
    %47 = vector.extract_strided_slice %28 {offsets = [0, 3], sizes = [8, 1], strides = [1, 1]} : vector<8x4xf32> to vector<8x1xf32>
    %48 = arith.mulf %46, %46 : vector<8x1xf32>
    %49 = arith.subf %47, %48 : vector<8x1xf32>
    %cst_24 = arith.constant 1.00195694 : f32
    %50 = vector.broadcast %cst_24 : f32 to vector<8x1xf32>
    %51 = arith.mulf %49, %50 : vector<8x1xf32>
    %cst_25 = arith.constant 9.99999968E-21 : f32
    %52 = vector.broadcast %cst_25 : f32 to vector<8x1xf32>
    %53 = arith.maximumf %51, %52 : vector<8x1xf32>
    %54 = math.rsqrt %53 : vector<8x1xf32>
    %55 = arith.mulf %5, %54 : vector<8x1xf32>
    %56 = arith.mulf %46, %55 : vector<8x1xf32>
    %57 = arith.subf %6, %56 : vector<8x1xf32>
    %58 = vector.extract_strided_slice %14 {offsets = [0, 256], sizes = [8, 256], strides = [1, 1]} : vector<8x512xf32> to vector<8x256xf32>
    %59 = vector.broadcast %55 : vector<8x1xf32> to vector<8x256xf32>
    %60 = arith.mulf %58, %59 : vector<8x256xf32>
    %61 = vector.broadcast %57 : vector<8x1xf32> to vector<8x256xf32>
    %62 = arith.addf %60, %61 : vector<8x256xf32>
    %63 = tpu.concatenate %45, %62 in 1 : vector<8x256xf32>, vector<8x256xf32> -> vector<8x512xf32>
    %cst_26 = arith.constant 2.000000e-01 : f32
    %64 = vector.broadcast %cst_26 : f32 to vector<8x512xf32>
    %65 = arith.mulf %64, %63 : vector<8x512xf32>
    %66 = arith.maximumf %63, %65 : vector<8x512xf32>
    %c34_i32 = arith.constant 34 : i32
    %67 = tpu.dynamic_rotate %66 by %c34_i32 dim 1 : vector<8x512xf32>, i32 -> vector<8x512xf32>
    %c0_27 = arith.constant 0 : index
    %c0_28 = arith.constant 0 : index
    %68 = vector.load %arg7[%c0_27, %c0_28] : memref<72x512xf32, #tpu.memory_space<vmem>>, vector<8x512xf32>
    %69 = arith.mulf %67, %68 : vector<8x512xf32>
    %c0_29 = arith.constant 0 : index
    %c0_30 = arith.constant 0 : index
    %70 = vector.load %arg9[%c0_29, %c0_30] : memref<72x512xf32, #tpu.memory_space<vmem>>, vector<8x512xf32>
    tpu.vector_store %arg9[%c0_29, %c0_30], %69 {strides = array<i32>} : memref<72x512xf32, #tpu.memory_space<vmem>>, vector<8x512xf32>,
    %c32_i32 = arith.constant 32 : i32
    %71 = tpu.dynamic_rotate %66 by %c32_i32 dim 1 : vector<8x512xf32>, i32 -> vector<8x512xf32>
    %c8_31 = arith.constant 8 : index
    %c0_32 = arith.constant 0 : index
    %72 = vector.load %arg7[%c8_31, %c0_32] : memref<72x512xf32, #tpu.memory_space<vmem>>, vector<8x512xf32>
    %73 = arith.mulf %71, %72 : vector<8x512xf32>
    %c8_33 = arith.constant 8 : index
    %c0_34 = arith.constant 0 : index
    %74 = vector.load %arg9[%c8_33, %c0_34] : memref<72x512xf32, #tpu.memory_space<vmem>>, vector<8x512xf32>
    tpu.vector_store %arg9[%c8_33, %c0_34], %73 {strides = array<i32>} : memref<72x512xf32, #tpu.memory_space<vmem>>, vector<8x512xf32>,
    %c30_i32 = arith.constant 30 : i32
    %75 = tpu.dynamic_rotate %66 by %c30_i32 dim 1 : vector<8x512xf32>, i32 -> vector<8x512xf32>
    %c16_35 = arith.constant 16 : index
    %c0_36 = arith.constant 0 : index
    %76 = vector.load %arg7[%c16_35, %c0_36] : memref<72x512xf32, #tpu.memory_space<vmem>>, vector<8x512xf32>
    %77 = arith.mulf %75, %76 : vector<8x512xf32>
    %c16_37 = arith.constant 16 : index
    %c0_38 = arith.constant 0 : index
    %78 = vector.load %arg9[%c16_37, %c0_38] : memref<72x512xf32, #tpu.memory_space<vmem>>, vector<8x512xf32>
    tpu.vector_store %arg9[%c16_37, %c0_38], %77 {strides = array<i32>} : memref<72x512xf32, #tpu.memory_space<vmem>>, vector<8x512xf32>,
    %c2_i32 = arith.constant 2 : i32
    %79 = tpu.dynamic_rotate %66 by %c2_i32 dim 1 : vector<8x512xf32>, i32 -> vector<8x512xf32>
    %c24_39 = arith.constant 24 : index
    %c0_40 = arith.constant 0 : index
    %80 = vector.load %arg7[%c24_39, %c0_40] : memref<72x512xf32, #tpu.memory_space<vmem>>, vector<8x512xf32>
    %81 = arith.mulf %79, %80 : vector<8x512xf32>
    %c24_41 = arith.constant 24 : index
    %c0_42 = arith.constant 0 : index
    %82 = vector.load %arg9[%c24_41, %c0_42] : memref<72x512xf32, #tpu.memory_space<vmem>>, vector<8x512xf32>
    tpu.vector_store %arg9[%c24_41, %c0_42], %81 {strides = array<i32>} : memref<72x512xf32, #tpu.memory_space<vmem>>, vector<8x512xf32>,
    %c32_43 = arith.constant 32 : index
    %c0_44 = arith.constant 0 : index
    %83 = vector.load %arg7[%c32_43, %c0_44] : memref<72x512xf32, #tpu.memory_space<vmem>>, vector<8x512xf32>
    %84 = arith.mulf %66, %83 : vector<8x512xf32>
    %c32_45 = arith.constant 32 : index
    %c0_46 = arith.constant 0 : index
    %85 = vector.load %arg9[%c32_45, %c0_46] : memref<72x512xf32, #tpu.memory_space<vmem>>, vector<8x512xf32>
    tpu.vector_store %arg9[%c32_45, %c0_46], %84 {strides = array<i32>} : memref<72x512xf32, #tpu.memory_space<vmem>>, vector<8x512xf32>,
    %c510_i32 = arith.constant 510 : i32
    %86 = tpu.dynamic_rotate %66 by %c510_i32 dim 1 : vector<8x512xf32>, i32 -> vector<8x512xf32>
    %c40 = arith.constant 40 : index
    %c0_47 = arith.constant 0 : index
    %87 = vector.load %arg7[%c40, %c0_47] : memref<72x512xf32, #tpu.memory_space<vmem>>, vector<8x512xf32>
    %88 = arith.mulf %86, %87 : vector<8x512xf32>
    %c40_48 = arith.constant 40 : index
    %c0_49 = arith.constant 0 : index
    %89 = vector.load %arg9[%c40_48, %c0_49] : memref<72x512xf32, #tpu.memory_space<vmem>>, vector<8x512xf32>
    tpu.vector_store %arg9[%c40_48, %c0_49], %88 {strides = array<i32>} : memref<72x512xf32, #tpu.memory_space<vmem>>, vector<8x512xf32>,
    %c482_i32 = arith.constant 482 : i32
    %90 = tpu.dynamic_rotate %66 by %c482_i32 dim 1 : vector<8x512xf32>, i32 -> vector<8x512xf32>
    %c48 = arith.constant 48 : index
    %c0_50 = arith.constant 0 : index
    %91 = vector.load %arg7[%c48, %c0_50] : memref<72x512xf32, #tpu.memory_space<vmem>>, vector<8x512xf32>
    %92 = arith.mulf %90, %91 : vector<8x512xf32>
    %c48_51 = arith.constant 48 : index
    %c0_52 = arith.constant 0 : index
    %93 = vector.load %arg9[%c48_51, %c0_52] : memref<72x512xf32, #tpu.memory_space<vmem>>, vector<8x512xf32>
    tpu.vector_store %arg9[%c48_51, %c0_52], %92 {strides = array<i32>} : memref<72x512xf32, #tpu.memory_space<vmem>>, vector<8x512xf32>,
    %c480_i32 = arith.constant 480 : i32
    %94 = tpu.dynamic_rotate %66 by %c480_i32 dim 1 : vector<8x512xf32>, i32 -> vector<8x512xf32>
    %c56 = arith.constant 56 : index
    %c0_53 = arith.constant 0 : index
    %95 = vector.load %arg7[%c56, %c0_53] : memref<72x512xf32, #tpu.memory_space<vmem>>, vector<8x512xf32>
    %96 = arith.mulf %94, %95 : vector<8x512xf32>
    %c56_54 = arith.constant 56 : index
    %c0_55 = arith.constant 0 : index
    %97 = vector.load %arg9[%c56_54, %c0_55] : memref<72x512xf32, #tpu.memory_space<vmem>>, vector<8x512xf32>
    tpu.vector_store %arg9[%c56_54, %c0_55], %96 {strides = array<i32>} : memref<72x512xf32, #tpu.memory_space<vmem>>, vector<8x512xf32>,
    %c478_i32 = arith.constant 478 : i32
    %98 = tpu.dynamic_rotate %66 by %c478_i32 dim 1 : vector<8x512xf32>, i32 -> vector<8x512xf32>
    %c64_56 = arith.constant 64 : index
    %c0_57 = arith.constant 0 : index
    %99 = vector.load %arg7[%c64_56, %c0_57] : memref<72x512xf32, #tpu.memory_space<vmem>>, vector<8x512xf32>
    %100 = arith.mulf %98, %99 : vector<8x512xf32>
    %c64_58 = arith.constant 64 : index
    %c0_59 = arith.constant 0 : index
    %101 = vector.load %arg9[%c64_58, %c0_59] : memref<72x512xf32, #tpu.memory_space<vmem>>, vector<8x512xf32>
    tpu.vector_store %arg9[%c64_58, %c0_59], %100 {strides = array<i32>} : memref<72x512xf32, #tpu.memory_space<vmem>>, vector<8x512xf32>,
    %c0_60 = arith.constant 0 : index
    %c0_61 = arith.constant 0 : index
    %102 = vector.load %arg3[%c0_60, %c0_61] : memref<8x72xf32, #tpu.memory_space<vmem>>, vector<8x72xf32>
    %c0_62 = arith.constant 0 : index
    %c0_63 = arith.constant 0 : index
    %103 = vector.load %arg9[%c0_62, %c0_63] : memref<72x512xf32, #tpu.memory_space<vmem>>, vector<72x512xf32>
    %cst_64 = arith.constant dense<0.000000e+00> : vector<8x512xf32>
    %104 = tpu.matmul %102, %103, %cst_64 {dimension_numbers = #tpu.dot_dimension_numbers<[1], [0], [0], [1], [0, 0, 1, 1], [], []>} : vector<8x72xf32>, vector<72x512xf32>, vector<8x512xf32> -> vector<8x512xf32>
    %105 = vector.extract_strided_slice %104 {offsets = [0, 0], sizes = [8, 256], strides = [1, 1]} : vector<8x512xf32> to vector<8x256xf32>
    %cst_65 = arith.constant dense<0.000000e+00> : vector<8xf32>
    %106 = vector.multi_reduction <add>, %105, %cst_65 [1] : vector<8x256xf32> to vector<8xf32>
    %107 = vector.shape_cast %106 : vector<8xf32> to vector<8x1xf32>
    %108 = arith.mulf %105, %105 : vector<8x256xf32>
    %cst_66 = arith.constant dense<0.000000e+00> : vector<8xf32>
    %109 = vector.multi_reduction <add>, %108, %cst_66 [1] : vector<8x256xf32> to vector<8xf32>
    %110 = vector.shape_cast %109 : vector<8xf32> to vector<8x1xf32>
    %111 = vector.extract_strided_slice %104 {offsets = [0, 256], sizes = [8, 256], strides = [1, 1]} : vector<8x512xf32> to vector<8x256xf32>
    %cst_67 = arith.constant dense<0.000000e+00> : vector<8xf32>
    %112 = vector.multi_reduction <add>, %111, %cst_67 [1] : vector<8x256xf32> to vector<8xf32>
    %113 = vector.shape_cast %112 : vector<8xf32> to vector<8x1xf32>
    %114 = arith.mulf %111, %111 : vector<8x256xf32>
    %cst_68 = arith.constant dense<0.000000e+00> : vector<8xf32>
    %115 = vector.multi_reduction <add>, %114, %cst_68 [1] : vector<8x256xf32> to vector<8xf32>
    %116 = vector.shape_cast %115 : vector<8xf32> to vector<8x1xf32>
    %117 = tpu.concatenate %107, %110, %113, %116 in 1 : vector<8x1xf32>, vector<8x1xf32>, vector<8x1xf32>, vector<8x1xf32> -> vector<8x4xf32>
    %cst_69 = arith.constant dense<0.000000e+00> : vector<8x4xf32>
    %118 = tpu.matmul %12, %117, %cst_69 {dimension_numbers = #tpu.dot_dimension_numbers<[1], [0], [0], [1], [0, 0, 1, 1], [], []>} : vector<8x8xf32>, vector<8x4xf32>, vector<8x4xf32> -> vector<8x4xf32>
    %119 = vector.extract_strided_slice %118 {offsets = [0, 0], sizes = [8, 1], strides = [1, 1]} : vector<8x4xf32> to vector<8x1xf32>
    %120 = vector.extract_strided_slice %118 {offsets = [0, 1], sizes = [8, 1], strides = [1, 1]} : vector<8x4xf32> to vector<8x1xf32>
    %121 = arith.mulf %119, %119 : vector<8x1xf32>
    %122 = arith.subf %120, %121 : vector<8x1xf32>
    %cst_70 = arith.constant 1.00195694 : f32
    %123 = vector.broadcast %cst_70 : f32 to vector<8x1xf32>
    %124 = arith.mulf %122, %123 : vector<8x1xf32>
    %cst_71 = arith.constant 9.99999968E-21 : f32
    %125 = vector.broadcast %cst_71 : f32 to vector<8x1xf32>
    %126 = arith.maximumf %124, %125 : vector<8x1xf32>
    %127 = math.rsqrt %126 : vector<8x1xf32>
    %128 = arith.mulf %7, %127 : vector<8x1xf32>
    %129 = arith.mulf %119, %128 : vector<8x1xf32>
    %130 = arith.subf %8, %129 : vector<8x1xf32>
    %131 = vector.extract_strided_slice %104 {offsets = [0, 0], sizes = [8, 256], strides = [1, 1]} : vector<8x512xf32> to vector<8x256xf32>
    %132 = vector.broadcast %128 : vector<8x1xf32> to vector<8x256xf32>
    %133 = arith.mulf %131, %132 : vector<8x256xf32>
    %134 = vector.broadcast %130 : vector<8x1xf32> to vector<8x256xf32>
    %135 = arith.addf %133, %134 : vector<8x256xf32>
    %136 = vector.extract_strided_slice %118 {offsets = [0, 2], sizes = [8, 1], strides = [1, 1]} : vector<8x4xf32> to vector<8x1xf32>
    %137 = vector.extract_strided_slice %118 {offsets = [0, 3], sizes = [8, 1], strides = [1, 1]} : vector<8x4xf32> to vector<8x1xf32>
    %138 = arith.mulf %136, %136 : vector<8x1xf32>
    %139 = arith.subf %137, %138 : vector<8x1xf32>
    %cst_72 = arith.constant 1.00195694 : f32
    %140 = vector.broadcast %cst_72 : f32 to vector<8x1xf32>
    %141 = arith.mulf %139, %140 : vector<8x1xf32>
    %cst_73 = arith.constant 9.99999968E-21 : f32
    %142 = vector.broadcast %cst_73 : f32 to vector<8x1xf32>
    %143 = arith.maximumf %141, %142 : vector<8x1xf32>
    %144 = math.rsqrt %143 : vector<8x1xf32>
    %145 = arith.mulf %7, %144 : vector<8x1xf32>
    %146 = arith.mulf %136, %145 : vector<8x1xf32>
    %147 = arith.subf %8, %146 : vector<8x1xf32>
    %148 = vector.extract_strided_slice %104 {offsets = [0, 256], sizes = [8, 256], strides = [1, 1]} : vector<8x512xf32> to vector<8x256xf32>
    %149 = vector.broadcast %145 : vector<8x1xf32> to vector<8x256xf32>
    %150 = arith.mulf %148, %149 : vector<8x256xf32>
    %151 = vector.broadcast %147 : vector<8x1xf32> to vector<8x256xf32>
    %152 = arith.addf %150, %151 : vector<8x256xf32>
    %153 = tpu.concatenate %135, %152 in 1 : vector<8x256xf32>, vector<8x256xf32> -> vector<8x512xf32>
    %cst_74 = arith.constant 2.000000e-01 : f32
    %154 = vector.broadcast %cst_74 : f32 to vector<8x512xf32>
    %155 = arith.mulf %154, %153 : vector<8x512xf32>
    %156 = arith.maximumf %153, %155 : vector<8x512xf32>
    %c0_75 = arith.constant 0 : index
    %c0_76 = arith.constant 0 : index
    %157 = vector.load %arg4[%c0_75, %c0_76] : memref<32x8xf32, #tpu.memory_space<vmem>>, vector<32x8xf32>
    %cst_77 = arith.constant dense<0.000000e+00> : vector<32x512xf32>
    %158 = tpu.matmul %157, %156, %cst_77 {dimension_numbers = #tpu.dot_dimension_numbers<[1], [0], [0], [1], [0, 0, 1, 1], [], []>} : vector<32x8xf32>, vector<8x512xf32>, vector<32x512xf32> -> vector<32x512xf32>
    %159 = vector.extract_strided_slice %158 {offsets = [0, 0], sizes = [32, 256], strides = [1, 1]} : vector<32x512xf32> to vector<32x256xf32>
    %cst_78 = arith.constant dense<0.000000e+00> : vector<32xf32>
    %160 = vector.multi_reduction <add>, %159, %cst_78 [1] : vector<32x256xf32> to vector<32xf32>
    %161 = vector.shape_cast %160 : vector<32xf32> to vector<32x1xf32>
    %162 = arith.mulf %159, %159 : vector<32x256xf32>
    %cst_79 = arith.constant dense<0.000000e+00> : vector<32xf32>
    %163 = vector.multi_reduction <add>, %162, %cst_79 [1] : vector<32x256xf32> to vector<32xf32>
    %164 = vector.shape_cast %163 : vector<32xf32> to vector<32x1xf32>
    %165 = vector.extract_strided_slice %158 {offsets = [0, 256], sizes = [32, 256], strides = [1, 1]} : vector<32x512xf32> to vector<32x256xf32>
    %cst_80 = arith.constant dense<0.000000e+00> : vector<32xf32>
    %166 = vector.multi_reduction <add>, %165, %cst_80 [1] : vector<32x256xf32> to vector<32xf32>
    %167 = vector.shape_cast %166 : vector<32xf32> to vector<32x1xf32>
    %168 = arith.mulf %165, %165 : vector<32x256xf32>
    %cst_81 = arith.constant dense<0.000000e+00> : vector<32xf32>
    %169 = vector.multi_reduction <add>, %168, %cst_81 [1] : vector<32x256xf32> to vector<32xf32>
    %170 = vector.shape_cast %169 : vector<32xf32> to vector<32x1xf32>
    %171 = tpu.concatenate %161, %164, %167, %170 in 1 : vector<32x1xf32>, vector<32x1xf32>, vector<32x1xf32>, vector<32x1xf32> -> vector<32x4xf32>
    %cst_82 = arith.constant dense<0.000000e+00> : vector<32x4xf32>
    %172 = tpu.matmul %11, %171, %cst_82 {dimension_numbers = #tpu.dot_dimension_numbers<[1], [0], [0], [1], [0, 0, 1, 1], [], []>} : vector<32x32xf32>, vector<32x4xf32>, vector<32x4xf32> -> vector<32x4xf32>
    %173 = vector.extract_strided_slice %172 {offsets = [0, 0], sizes = [32, 1], strides = [1, 1]} : vector<32x4xf32> to vector<32x1xf32>
    %174 = vector.extract_strided_slice %172 {offsets = [0, 1], sizes = [32, 1], strides = [1, 1]} : vector<32x4xf32> to vector<32x1xf32>
    %175 = arith.mulf %173, %173 : vector<32x1xf32>
    %176 = arith.subf %174, %175 : vector<32x1xf32>
    %cst_83 = arith.constant 1.00048852 : f32
    %177 = vector.broadcast %cst_83 : f32 to vector<32x1xf32>
    %178 = arith.mulf %176, %177 : vector<32x1xf32>
    %cst_84 = arith.constant 9.99999968E-21 : f32
    %179 = vector.broadcast %cst_84 : f32 to vector<32x1xf32>
    %180 = arith.maximumf %178, %179 : vector<32x1xf32>
    %181 = math.rsqrt %180 : vector<32x1xf32>
    %182 = arith.mulf %9, %181 : vector<32x1xf32>
    %183 = arith.mulf %173, %182 : vector<32x1xf32>
    %184 = arith.subf %10, %183 : vector<32x1xf32>
    %185 = vector.extract_strided_slice %158 {offsets = [0, 0], sizes = [32, 256], strides = [1, 1]} : vector<32x512xf32> to vector<32x256xf32>
    %186 = vector.broadcast %182 : vector<32x1xf32> to vector<32x256xf32>
    %187 = arith.mulf %185, %186 : vector<32x256xf32>
    %188 = vector.broadcast %184 : vector<32x1xf32> to vector<32x256xf32>
    %189 = arith.addf %187, %188 : vector<32x256xf32>
    %190 = vector.extract_strided_slice %172 {offsets = [0, 2], sizes = [32, 1], strides = [1, 1]} : vector<32x4xf32> to vector<32x1xf32>
    %191 = vector.extract_strided_slice %172 {offsets = [0, 3], sizes = [32, 1], strides = [1, 1]} : vector<32x4xf32> to vector<32x1xf32>
    %192 = arith.mulf %190, %190 : vector<32x1xf32>
    %193 = arith.subf %191, %192 : vector<32x1xf32>
    %cst_85 = arith.constant 1.00048852 : f32
    %194 = vector.broadcast %cst_85 : f32 to vector<32x1xf32>
    %195 = arith.mulf %193, %194 : vector<32x1xf32>
    %cst_86 = arith.constant 9.99999968E-21 : f32
    %196 = vector.broadcast %cst_86 : f32 to vector<32x1xf32>
    %197 = arith.maximumf %195, %196 : vector<32x1xf32>
    %198 = math.rsqrt %197 : vector<32x1xf32>
    %199 = arith.mulf %9, %198 : vector<32x1xf32>
    %200 = arith.mulf %190, %199 : vector<32x1xf32>
    %201 = arith.subf %10, %200 : vector<32x1xf32>
    %202 = vector.extract_strided_slice %158 {offsets = [0, 256], sizes = [32, 256], strides = [1, 1]} : vector<32x512xf32> to vector<32x256xf32>
    %203 = vector.broadcast %199 : vector<32x1xf32> to vector<32x256xf32>
    %204 = arith.mulf %202, %203 : vector<32x256xf32>
    %205 = vector.broadcast %201 : vector<32x1xf32> to vector<32x256xf32>
    %206 = arith.addf %204, %205 : vector<32x256xf32>
    %207 = tpu.concatenate %189, %206 in 1 : vector<32x256xf32>, vector<32x256xf32> -> vector<32x512xf32>
    %c0_87 = arith.constant 0 : index
    %c0_88 = arith.constant 0 : index
    %c0_89 = arith.constant 0 : index
    %208 = vector.load %arg1[%c0_87, %c0_88, %c0_89] : memref<2x32x256xf32, #tpu.memory_space<vmem>>, vector<1x32x256xf32>
    %209 = vector.shape_cast %208 : vector<1x32x256xf32> to vector<32x256xf32>
    %210 = vector.extract_strided_slice %207 {offsets = [0, 0], sizes = [32, 256], strides = [1, 1]} : vector<32x512xf32> to vector<32x256xf32>
    %211 = arith.addf %210, %209 : vector<32x256xf32>
    %cst_90 = arith.constant 2.000000e-01 : f32
    %212 = vector.broadcast %cst_90 : f32 to vector<32x256xf32>
    %213 = arith.mulf %212, %211 : vector<32x256xf32>
    %214 = arith.maximumf %211, %213 : vector<32x256xf32>
    %c0_91 = arith.constant 0 : index
    %c0_92 = arith.constant 0 : index
    %c0_93 = arith.constant 0 : index
    %215 = vector.load %arg8[%c0_91, %c0_92, %c0_93] : memref<2x32x256xf32, #tpu.memory_space<vmem>>, vector<1x32x256xf32>
    %216 = vector.shape_cast %215 : vector<1x32x256xf32> to vector<32x256xf32>
    %217 = vector.shape_cast %214 : vector<32x256xf32> to vector<1x32x256xf32>
    tpu.vector_store %arg8[%c0_91, %c0_92, %c0_93], %217 {strides = array<i32>} : memref<2x32x256xf32, #tpu.memory_space<vmem>>, vector<1x32x256xf32>,
    %c1_94 = arith.constant 1 : index
    %c0_95 = arith.constant 0 : index
    %c0_96 = arith.constant 0 : index
    %218 = vector.load %arg1[%c1_94, %c0_95, %c0_96] : memref<2x32x256xf32, #tpu.memory_space<vmem>>, vector<1x32x256xf32>
    %219 = vector.shape_cast %218 : vector<1x32x256xf32> to vector<32x256xf32>
    %220 = vector.extract_strided_slice %207 {offsets = [0, 256], sizes = [32, 256], strides = [1, 1]} : vector<32x512xf32> to vector<32x256xf32>
    %221 = arith.addf %220, %219 : vector<32x256xf32>
    %cst_97 = arith.constant 2.000000e-01 : f32
    %222 = vector.broadcast %cst_97 : f32 to vector<32x256xf32>
    %223 = arith.mulf %222, %221 : vector<32x256xf32>
    %224 = arith.maximumf %221, %223 : vector<32x256xf32>
    %c1_98 = arith.constant 1 : index
    %c0_99 = arith.constant 0 : index
    %c0_100 = arith.constant 0 : index
    %225 = vector.load %arg8[%c1_98, %c0_99, %c0_100] : memref<2x32x256xf32, #tpu.memory_space<vmem>>, vector<1x32x256xf32>
    %226 = vector.shape_cast %225 : vector<1x32x256xf32> to vector<32x256xf32>
    %227 = vector.shape_cast %224 : vector<32x256xf32> to vector<1x32x256xf32>
    tpu.vector_store %arg8[%c1_98, %c0_99, %c0_100], %227 {strides = array<i32>} : memref<2x32x256xf32, #tpu.memory_space<vmem>>, vector<1x32x256xf32>,
    return
  }
  func.func @transform_0(%arg0: i32) -> (i32, i32, i32) {
    %c0_i32 = arith.constant 0 : i32
    %c0_i32_0 = arith.constant 0 : i32
    %c0_i32_1 = arith.constant 0 : i32
    %c0_i32_2 = arith.constant 0 : i32
    return %c0_i32, %c0_i32_0, %c0_i32_1 : i32, i32, i32
  }
  func.func @transform_1(%arg0: i32) -> (i32, i32) {
    %c0_i32 = arith.constant 0 : i32
    %c0_i32_0 = arith.constant 0 : i32
    %c0_i32_1 = arith.constant 0 : i32
    return %c0_i32, %c0_i32_0 : i32, i32
  }
  func.func @transform_2(%arg0: i32) -> (i32, i32) {
    %c0_i32 = arith.constant 0 : i32
    %c0_i32_0 = arith.constant 0 : i32
    %c0_i32_1 = arith.constant 0 : i32
    return %c0_i32, %c0_i32_0 : i32, i32
  }
  func.func @transform_3(%arg0: i32) -> (i32, i32) {
    %c0_i32 = arith.constant 0 : i32
    %c0_i32_0 = arith.constant 0 : i32
    %c0_i32_1 = arith.constant 0 : i32
    return %c0_i32, %c0_i32_0 : i32, i32
  }
  func.func @transform_4(%arg0: i32) -> (i32, i32) {
    %c0_i32 = arith.constant 0 : i32
    %c0_i32_0 = arith.constant 0 : i32
    %c0_i32_1 = arith.constant 0 : i32
    return %c0_i32, %c0_i32_0 : i32, i32
  }
  func.func @transform_5(%arg0: i32) -> (i32, i32) {
    %c0_i32 = arith.constant 0 : i32
    %c0_i32_0 = arith.constant 0 : i32
    %c0_i32_1 = arith.constant 0 : i32
    return %c0_i32, %c0_i32_0 : i32, i32
  }
  func.func @transform_6(%arg0: i32) -> (i32, i32) {
    %c0_i32 = arith.constant 0 : i32
    %c0_i32_0 = arith.constant 0 : i32
    %c0_i32_1 = arith.constant 0 : i32
    return %c0_i32, %c0_i32_0 : i32, i32
  }
  func.func @transform_7(%arg0: i32) -> (i32, i32, i32) {
    %c0_i32 = arith.constant 0 : i32
    %c0_i32_0 = arith.constant 0 : i32
    %c0_i32_1 = arith.constant 0 : i32
    %c0_i32_2 = arith.constant 0 : i32
    return %c0_i32, %c0_i32_0, %c0_i32_1 : i32, i32, i32
  }
}

</mosaic_0001>

<bundles_post_ra>
// kernel: tpu_custom_call.1
= control target key start
LH: loop header
LB: loop body
LE: loop exit
PB: predicated region body
PF: predicated region fallthrough
CT: control target
= control target key end

     0   :  { %12 = vsyncpa [#allocation4], 0  ;;  %s2523_s0 = inlined_call_operand.vmem [shape: f32[2,32,256], index: 0, kind: input, shape index: {}]   ;;  %s2524_s1 = inlined_call_operand.vmem [shape: f32[8,32], index: 1, kind: input, shape index: {}]   ;;  %s2525_s2 = inlined_call_operand.vmem [shape: f32[8,72], index: 2, kind: input, shape index: {}]   ;;  %s2526_s3 = inlined_call_operand.vmem [shape: f32[32,8], index: 3, kind: input, shape index: {}]   ;;  %s2527_s4 = inlined_call_operand.vmem [shape: f32[96,1], index: 4, kind: input, shape index: {}]   ;;  %s2528_s5 = inlined_call_operand.vmem [shape: f32[40,32], index: 5, kind: input, shape index: {}]   ;;  %s2529_s6 = inlined_call_operand.hbm [shape: f32[72,512], index: 6, kind: input, shape index: {}]   ;;  %s2530_s7 = inlined_call_operand.hbm [shape: f32[2,32,256], index: 7, kind: output, shape index: {}]  }
   0x1   :  { %13 = vsyncpa [#allocation5], 0  ;;  %s1834_s24 = smov [#allocation3]   ;;  %s1786_s28 = scalar_lea.hbm %s2529_s6, 4608 }
   0x2   :  { %s31_s25 = sshll.u32 %s1834_s24, 4  ;;  %p1787_p0 = scmp.ne.s32.totalorder %s2529_s6, %s1786_s28  ;;  %s32_s25 = int_to_ptr.vmem [resolvable:$true] %s31_s25 }
   0x3   :  { %p1790_p1 = scmp.lt.u32.totalorder %s1786_s28, %s2529_s6 }
   0x5   :  { %p1792_p2 = pnand %p1790_p1, %p1787_p0 }
   0x7   :  { %1795 = shalt.err (!%p1792_p2)
}
   0x8   :  { %s1796_s10 = scalar_lea.vmem %s32_s25, 4608  ;;  %p1801_p4 = scmp.lt.s32.totalorder %s32_s25, %s32_s25 }
   0x9   :  { %p1797_p3 = scmp.ne.s32.totalorder %s32_s25, %s1796_s10  ;;  %p1802_p5 = scmp.lt.s32.totalorder %s1796_s10, %s1796_s10 }
   0xb   :  { %p1803_p6 = por %p1802_p5, %p1801_p4 }
   0xd   :  { %p1804_p7 = pnand %p1803_p6, %p1797_p3 }
   0xf   :  { %1807 = shalt.err (!%p1804_p7)
}
  0x10   :  { %s1835_s11 = smov 512   ;;  %s1836_s12 = smov 32  }
  0x11   :  { %37 = dma.hbm_to_vmem [thread:$0]  %s2529_s6, 4608, %s32_s25, [#allocation4], %s1835_s11, %s1835_s11, %s1836_s12  }
  0x12   :  { %1830 = dma.done.wait [#allocation4], 4608  }
  0x13   :  { %1831 = vsyncadd [#allocation4], 4294962688  ;;  %v1837_v0 = vmov 0.0   ;;  %v42_v1 = vld [vmem:[%s2523_s0 + $0x8] sm:$0xff]  ;;  %v44_v2 = vld [vmem:[%s2523_s0 + $0x18] sm:$0xff]  ;;  %vm76_vm0 = vcmask 261120  }
  0x14   :  { %144 = vmatprep.mubr.f32.mxu0 %v1837_v0  ;;  %215 = vmatprep.mubr.f32.mxu1 %v1837_v0  ;;  %v1628_v3 = vld [vmem:[%s2523_s0 + $0x48] sm:$0xff]  ;;  %v1697_v4 = vpack.c.bf16 %v44_v2, %v42_v1  ;;  %v1630_v5 = vld [vmem:[%s2523_s0 + $0x58] sm:$0xff]  ;;  %v41_v6 = vld [vmem:[%s2523_s0] sm:$0xff]  ;;  %vm1838_vm1 = vmmov 0   ;;  %vm238_vm2 = vcmask 7168   ;;  %vm240_vm3 = vcmask 15360  }
  0x15   :  { %v43_v7 = vld [vmem:[%s2523_s0 + $0x10] sm:$0xff]  ;;  %v1705_v8 = vpack.c.bf16 %v1630_v5, %v1628_v3  ;;  %v1627_v10 = vld [vmem:[%s2523_s0 + $0x40] sm:$0xff]  ;;  %v46_v12 = vld [vmem:[%s2523_s0 + $0x28] sm:$0xff]  ;;  %vm242_vm4 = vcmask 23552   ;;  %vm244_vm5 = vcmask 64512   ;;  %s1839_s26 = smov 1  }
  0x16   :  { %v1699_v9 = vpack.c.bf16 %v43_v7, %v41_v6  ;;  %v1629_v11 = vld [vmem:[%s2523_s0 + $0x50] sm:$0xff]  ;;  %1698 = vmatprep.subr.bf16.mxu0 %v1697_v4  ;;  %v48_v14 = vld [vmem:[%s2523_s0 + $0x38] sm:$0xff]  ;;  %v1632_v15 = vld [vmem:[%s2523_s0 + $0x68] sm:$0xff]  ;;  %s1840_s27 = smov 125   ;;  %v1841_v54 = vmov 0   ;;  %s1842_s30 = smov 2  }
  0x17   :  { %v1707_v13 = vpack.c.bf16 %v1629_v11, %v1627_v10  ;;  %v1634_v16 = vld [vmem:[%s2523_s0 + $0x78] sm:$0xff]  ;;  %1706 = vmatprep.subr.bf16.mxu1 %v1705_v8  ;;  %v1701_v17 = vpack.c.bf16 %v48_v14, %v46_v12  ;;  %v45_v19 = vld [vmem:[%s2523_s0 + $0x20] sm:$0xff]  ;;  %v47_v20 = vld [vmem:[%s2523_s0 + $0x30] sm:$0xff]  ;;  %1773 = vset.pattern.permute.xlu0 %v1841_v54  ;;  %s1843_s8 = smov 127   ;;  %s1844_s9 = smov 126   ;;  %vm634_vm14 = vcmask 588800  }
  0x18   :  { %1700 = vmatpush1.bf16.msra.mxu0 %v1699_v9  ;;  %v1709_v18 = vpack.c.bf16 %v1634_v16, %v1632_v15  ;;  %v1631_v21 = vld [vmem:[%s2523_s0 + $0x60] sm:$0xff]  ;;  %v1703_v22 = vpack.c.bf16 %v47_v20, %v45_v19  ;;  %v1633_v23 = vld [vmem:[%s2523_s0 + $0x70] sm:$0xff]  ;;  %1772 = vset.pattern.permute.xlu1 %v1841_v54  ;;  %v59_v62 = vld [vmem:[%s2527_s4 + $0x8] sm:$0xff]  ;;  %s1845_s13 = smov 34   ;;  %s1846_s14 = smov 30  }
  0x19   :  { %1708 = vmatpush1.bf16.msra.mxu1 %v1707_v13  ;;  %1702 = vmatprep.subr.bf16.mxu0 %v1701_v17  ;;  %v1711_v24 = vpack.c.bf16 %v1633_v23, %v1631_v21  ;;  %v75_v25 = vld [vmem:[%s2524_s1] sm:$0xff]  ;;  %s1847_s15 = smov 98   ;;  %s1848_s16 = smov 96   ;;  %v391_v21 = vlaneseq }
  0x1a   :  { %1710 = vmatprep.subr.bf16.mxu1 %v1709_v18  ;;  %v1990_v44 = vld [vmem:[%s2528_s5 + $0x20] sm:$0xff]  ;;  %s1850_s28 = smov [#allocation6]  }
  0x1b   :  { %v58_v55 = vld [vmem:[%s2527_s4] sm:$0xff]  ;;  %s1615_s29 = sshll.u32 %s1850_s28, 4  ;;  %s1616_s29 = int_to_ptr.vmem [resolvable:$true] %s1615_s29 }
  0x1c   :  { %1704 = vmatpush1.bf16.msra.mxu0 %v1703_v22  ;;  %p1813_p9 = scmp.lt.s32.totalorder %s1616_s29, %s1616_s29 }
  0x1d   :  { %1712 = vmatpush1.bf16.msra.mxu1 %v1711_v24  ;;  %v2045_v24 = vand.u32 127, %v391_v21 }
  0x1e   :  { %1673 = vmatprep.subr.mxu1 %v1837_v0 }
  0x1f   :  { %1635 = vmatmul.mubr.msk.f32.vlgmr.msra.gmra.mrb[0].mxu0 %vm76_vm0, %v75_v25  ;;  %vm393_vm6 = vcmp.lt.s32.totalorder %v2045_v24, 34  ;;  %vm418_vm7 = vcmp.lt.s32.totalorder %v2045_v24, 32  ;;  %vm468_vm8 = vcmp.lt.s32.totalorder %v2045_v24, 2  ;;  %vm443_vm9 = vcmp.lt.s32.totalorder %v2045_v24, 30 }
  0x20   :  { %1636 = vmatmul.mubr.msk.f32.vlgmr.msra.gmra.mrb[0].mxu1 %vm76_vm0, %v75_v25  ;;  %773 = vmatprep.mubr.f32.mxu0 %v1837_v0  ;;  %vm505_vm10 = vcmp.lt.s32.totalorder %v2045_v24, 126  ;;  %vm530_vm11 = vcmp.lt.s32.totalorder %v2045_v24, 98  ;;  %vm555_vm12 = vcmp.lt.s32.totalorder %v2045_v24, 96  ;;  %vm580_vm13 = vcmp.lt.s32.totalorder %v2045_v24, 94 }
  0x21   :  { %1675 = vmatprep.mubr.msk.f32.mxu1 %vm1838_vm1, %v1837_v0 }
  0xf2   :  { %v1963_v26 = vpop.f32.mrb[0].mxu0 }
  0xf3   :  { %v1965_v27 = vpop.f32.mrb[0].mxu1  ;;  %v1967_v28 = vpop.f32.mrb[1].mxu0  ;;  %v225_v29 = vmul.f32 %v1963_v26, %v1963_v26 }
  0xf4   :  { %v1971_v30 = vpop.f32.mrb[1].mxu1  ;;  %v222_v31 = vadd.f32 %v1967_v28, %v1963_v26  ;;  %v233_v32 = vmul.f32 %v1965_v27, %v1965_v27  ;;  %v226_v33 = vmul.f32 %v1967_v28, %v1967_v28 }
  0xf5   :  { %v230_v34 = vadd.f32 %v1971_v30, %v1965_v27  ;;  %v234_v35 = vmul.f32 %v1971_v30, %v1971_v30 }
  0xf6   :  { %223 = vadd.xlane.f32.xlu0 %v222_v31  ;;  %v227_v36 = vadd.f32 %v226_v33, %v225_v29 }
  0xf7   :  { %231 = vadd.xlane.f32.xlu1 %v230_v34  ;;  %v235_v37 = vadd.f32 %v234_v35, %v233_v32 }
  0xfa   :  { %228 = vadd.xlane.f32.xlu0 %v227_v36 }
  0xfb   :  { %236 = vadd.xlane.f32.xlu1 %v235_v37 }
 0x183   :  { %v224_v38 = vpop.xlane.xlu0 %223 }
 0x184   :  { %v232_v39 = vpop.xlane.xlu1 %231 }
 0x187   :  { %v229_v40 = vpop.xlane.xlu0 %228 }
 0x188   :  { %v239_v41 = vsel %vm238_vm2, %v224_v38, %v229_v40  ;;  %v237_v42 = vpop.xlane.xlu1 %236 }
 0x189   :  { %v241_v43 = vsel %vm240_vm3, %v239_v41, %v232_v39 }
 0x18a   :  { %v243_v45 = vsel %vm242_vm4, %v241_v43, %v237_v42 }
 0x18b   :  { %1674 = vmatpush3.msra.mxu1 %v243_v45 }
 0x18c   :  { %1676 = vmatmul.mubr.msk.f32.vlgmr.msra.gmra.mrb[2].mxu1 %vm244_vm5, %v1990_v44 }
 0x18d   :  { %702 = vmatprep.mubr.f32.mxu1 %v1837_v0 }
 0x25f   :  { %v314_v46 = vpop.f32.mrb[2].mxu1 }
 0x260   :  { %v1677_v47 = vpop.f32.mrb[3].mxu1  ;;  %v318_v48 = vmul.f32 %v314_v46, %v314_v46 }
 0x262   :  { %320 = vrot.lane.b32.xlu0 %v318_v48, %s1839_s26  ;;  %v449_v48 = vld [vmem:[#allocation3 + $0x48] sm:$0xff] }
 0x2d4   :  { %v321_v49 = vpop.permute.xlu0 %320 }
 0x2d5   :  { %v323_v50 = vsub.f32 %v314_v46, %v321_v49 }
 0x2d7   :  { %v324_v51 = vmul.f32 1.0019569, %v323_v50  ;;  %v398_v50 = vld [vmem:[#allocation3] sm:$0xff] }
 0x2d9   :  { %v325_v52 = vmax.f32 %v324_v51, 1e-20  ;;  %v423_v51 = vld [vmem:[#allocation3 + $0x20] sm:$0xff] }
 0x2db   :  { %1774 = vrsqrt.f32 %v325_v52 }
 0x2e5   :  { %v1775_v53 = vpop.eup %1774 }
 0x2e6   :  { %348 = vrot.lane.b32.xlu1 %v1775_v53, %s1840_s27 }
 0x358   :  { %v349_v56 = vpop.permute.xlu1 %348 }
 0x359   :  { %v351_v57 = vmul.f32 %v349_v56, %v58_v55 }
 0x35b   :  { %353 = vrot.lane.b32.xlu1 %v351_v57, %s1842_s30 }
 0x35f   :  { %328 = vrot.lane.b32.xlu1 %v1775_v53, %s1843_s8 }
 0x3cd   :  { %v354_v58 = vpop.permute.xlu1 %353 }
 0x3ce   :  { %v356_v59 = vmul.f32 %v354_v58, %v314_v46 }
 0x3d0   :  { %358 = vrot.lane.b32.xlu0 %v356_v59, %s1844_s9 }
 0x3d1   :  { %v329_v60 = vpop.permute.xlu1 %328 }
 0x3d2   :  { %v331_v61 = vmul.f32 %v329_v60, %v58_v55  ;;  %v400_v60 = vld [vmem:[#allocation3 + $0x10] sm:$0xff] }
 0x3d4   :  { %v332_v63 = vmul.f32 %v331_v61, %v314_v46  ;;  %363 = vperm.xlu0 %1773, %v351_v57   ;;  %336 = vperm.xlu1 %1772, %v331_v61   ;;  %v474_v46 = vld [vmem:[#allocation3 + $0x68] sm:$0xff]  ;;  %v401_v61 = vld [vmem:[#allocation3 + $0x18] sm:$0xff] }
 0x3d6   :  { %v333_v1 = vsub.f32 %v59_v62, %v332_v63  ;;  %v426_v63 = vld [vmem:[#allocation3 + $0x38] sm:$0xff] }
 0x3d8   :  { %343 = vperm.xlu1 %1772, %v333_v1  }
 0x442   :  { %v359_v2 = vpop.permute.xlu0 %358 }
 0x443   :  { %v361_v3 = vsub.f32 %v59_v62, %v359_v2  ;;  %v425_v62 = vld [vmem:[#allocation3 + $0x30] sm:$0xff] }
 0x445   :  { %370 = vperm.xlu1 %1772, %v361_v3  }
 0x453   :  { %v337_v4 = vpop.permute.xlu1 %336  ;;  %v364_v14 = vpop.permute.xlu0 %363 }
 0x454   :  { %v339_v5 = vmul.f32 %v337_v4, %v1963_v26  ;;  %v340_v6 = vmul.f32 %v337_v4, %v1967_v28  ;;  %v366_v15 = vmul.f32 %v364_v14, %v1965_v27  ;;  %v367_v16 = vmul.f32 %v364_v14, %v1971_v30  ;;  %v399_v28 = vld [vmem:[#allocation3 + $0x8] sm:$0xff] }
 0x455   :  { %v424_v30 = vld [vmem:[#allocation3 + $0x28] sm:$0xff] }
 0x457   :  { %v344_v7 = vpop.permute.xlu1 %343 }
 0x458   :  { %v346_v8 = vadd.f32 %v344_v7, %v339_v5  ;;  %v347_v9 = vadd.f32 %v344_v7, %v340_v6 }
 0x45a   :  { %v375_v10 = vmul.f32 0.2, %v346_v8  ;;  %v376_v11 = vmul.f32 0.2, %v347_v9 }
 0x45c   :  { %v2009_v12 = vmax.f32 %v346_v8, %v375_v10  ;;  %v2011_v13 = vmax.f32 %v347_v9, %v376_v11 }
 0x45e   :  { %385 = vrot.lane.b32.xlu1 %v2011_v13, %s1845_s13  ;;  %383 = vrot.lane.b32.xlu0 %v2009_v12, %s1845_s13 }
 0x462   :  { %412 = vrot.lane.b32.xlu1 %v2011_v13, %s1836_s12  ;;  %410 = vrot.lane.b32.xlu0 %v2009_v12, %s1836_s12 }
 0x466   :  { %437 = vrot.lane.b32.xlu1 %v2011_v13, %s1846_s14  ;;  %435 = vrot.lane.b32.xlu0 %v2009_v12, %s1846_s14 }
 0x46a   :  { %462 = vrot.lane.b32.xlu1 %v2011_v13, %s1842_s30  ;;  %460 = vrot.lane.b32.xlu0 %v2009_v12, %s1842_s30 }
 0x46e   :  { %499 = vrot.lane.b32.xlu0 %v2011_v13, %s1844_s9 }
 0x472   :  { %497 = vrot.lane.b32.xlu0 %v2009_v12, %s1844_s9 }
 0x476   :  { %524 = vrot.lane.b32.xlu0 %v2011_v13, %s1847_s15 }
 0x47a   :  { %549 = vrot.lane.b32.xlu0 %v2011_v13, %s1848_s16 }
 0x4c4   :  { %v371_v17 = vpop.permute.xlu1 %370 }
 0x4c5   :  { %v373_v18 = vadd.f32 %v371_v17, %v366_v15  ;;  %v374_v19 = vadd.f32 %v371_v17, %v367_v16  ;;  %v448_v15 = vld [vmem:[#allocation3 + $0x40] sm:$0xff] }
 0x4c6   :  { %v473_v16 = vld [vmem:[#allocation3 + $0x60] sm:$0xff] }
 0x4c7   :  { %v378_v20 = vmul.f32 0.2, %v374_v19  ;;  %v377_v22 = vmul.f32 0.2, %v373_v18 }
 0x4c9   :  { %v2039_v23 = vmax.f32 %v374_v19, %v378_v20  ;;  %v2047_v25 = vmax.f32 %v373_v18, %v377_v22 }
 0x4cb   :  { %416 = vrot.lane.b32.xlu1 %v2039_v23, %s1836_s12  ;;  %389 = vrot.lane.b32.xlu0 %v2039_v23, %s1845_s13 }
 0x4cf   :  { %414 = vrot.lane.b32.xlu1 %v2047_v25, %s1836_s12  ;;  %387 = vrot.lane.b32.xlu0 %v2047_v25, %s1845_s13  ;;  %s1849_s12 = smov 94  }
 0x4d0   :  { %v384_v26 = vpop.permute.xlu0 %383  ;;  %v2054_v27 = vpop.permute.xlu1 %385 }
 0x4d1   :  { %v396_v29 = vsel %vm393_vm6, %v384_v26, %v2054_v27 }
 0x4d2   :  { %v403_v34 = vmul.f32 %v399_v28, %v396_v29 }
 0x4d3   :  { %466 = vrot.lane.b32.xlu1 %v2039_v23, %s1842_s30  ;;  %441 = vrot.lane.b32.xlu0 %v2039_v23, %s1846_s14 }
 0x4d4   :  { %v411_v31 = vpop.permute.xlu0 %410  ;;  %v413_v32 = vpop.permute.xlu1 %412 }
 0x4d5   :  { %v421_v33 = vsel %vm418_vm7, %v411_v31, %v413_v32 }
 0x4d6   :  { %v428_v35 = vmul.f32 %v424_v30, %v421_v33 }
 0x4d7   :  { %547 = vrot.lane.b32.xlu1 %v2009_v12, %s1848_s16  ;;  %439 = vrot.lane.b32.xlu0 %v2047_v25, %s1846_s14 }
 0x4d8   :  { %v1713_v36 = vpack.c.bf16 %v428_v35, %v403_v34  ;;  %v436_v37 = vpop.permute.xlu0 %435  ;;  %v438_v41 = vpop.permute.xlu1 %437  ;;  %v475_v35 = vld [vmem:[#allocation3 + $0x70] sm:$0xff] }
 0x4d9   :  { %v446_v49 = vsel %vm443_vm9, %v436_v37, %v438_v41 }
 0x4da   :  { %1714 = vmatprep.subr.bf16.mxu1 %v1713_v36  ;;  %v453_v57 = vmul.f32 %v449_v48, %v446_v49  ;;  %v476_v36 = vld [vmem:[#allocation3 + $0x78] sm:$0xff]  ;;  %v510_v48 = vld [vmem:[#allocation3 + $0xa0] sm:$0xff] }
 0x4db   :  { %464 = vrot.lane.b32.xlu1 %v2047_v25, %s1842_s30  ;;  %522 = vrot.lane.b32.xlu0 %v2009_v12, %s1847_s15 }
 0x4dc   :  { %v461_v38 = vpop.permute.xlu0 %460  ;;  %v463_v43 = vpop.permute.xlu1 %462 }
 0x4dd   :  { %v471_v47 = vsel %vm468_vm8, %v461_v38, %v463_v43 }
 0x4de   :  { %v478_v52 = vmul.f32 %v474_v46, %v471_v47 }
 0x4df   :  { %501 = vrot.lane.b32.xlu1 %v2047_v25, %s1844_s9  ;;  %528 = vrot.lane.b32.xlu0 %v2039_v23, %s1847_s15 }
 0x4e0   :  { %v2090_v39 = vpop.permute.xlu0 %499  ;;  %v1717_v4 = vpack.c.bf16 %v478_v52, %v453_v57 }
 0x4e3   :  { %503 = vrot.lane.b32.xlu1 %v2039_v23, %s1844_s9  ;;  %574 = vrot.lane.b32.xlu0 %v2011_v13, %s1849_s12 }
 0x4e4   :  { %v2092_v40 = vpop.permute.xlu0 %497 }
 0x4e7   :  { %526 = vrot.lane.b32.xlu1 %v2047_v25, %s1847_s15  ;;  %572 = vrot.lane.b32.xlu0 %v2009_v12, %s1849_s12 }
 0x4e8   :  { %v2094_v42 = vpop.permute.xlu0 %524 }
 0x4eb   :  { %551 = vrot.lane.b32.xlu1 %v2047_v25, %s1848_s16 }
 0x4ec   :  { %v2098_v45 = vpop.permute.xlu0 %549 }
 0x4ef   :  { %553 = vrot.lane.b32.xlu1 %v2039_v23, %s1848_s16 }
 0x4f3   :  { %576 = vrot.lane.b32.xlu1 %v2047_v25, %s1849_s12 }
 0x4f7   :  { %578 = vrot.lane.b32.xlu1 %v2039_v23, %s1849_s12 }
 0x53d   :  { %v390_v53 = vpop.permute.xlu0 %389  ;;  %v417_v54 = vpop.permute.xlu1 %416 }
 0x53e   :  { %v397_v55 = vsel %vm393_vm6, %v390_v53, %v384_v26  ;;  %v422_v56 = vsel %vm418_vm7, %v417_v54, %v411_v31  ;;  %v450_v31 = vld [vmem:[#allocation3 + $0x50] sm:$0xff] }
 0x53f   :  { %v402_v58 = vmul.f32 %v398_v50, %v397_v55  ;;  %v427_v59 = vmul.f32 %v423_v51, %v422_v56  ;;  %v485_v55 = vld [vmem:[#allocation3 + $0x80] sm:$0xff] }
 0x541   :  { %v1715_v1 = vpack.c.bf16 %v427_v59, %v402_v58  ;;  %v388_v2 = vpop.permute.xlu0 %387  ;;  %v415_v3 = vpop.permute.xlu1 %414 }
 0x542   :  { %v394_v5 = vsel %vm393_vm6, %v388_v2, %v390_v53  ;;  %v395_v6 = vsel %vm393_vm6, %v2054_v27, %v388_v2  ;;  %v419_v7 = vsel %vm418_vm7, %v415_v3, %v417_v54  ;;  %v420_v8 = vsel %vm418_vm7, %v413_v32, %v415_v3  ;;  %v451_v32 = vld [vmem:[#allocation3 + $0x58] sm:$0xff]  ;;  %v511_v53 = vld [vmem:[#allocation3 + $0xa8] sm:$0xff] }
 0x543   :  { %v404_v9 = vmul.f32 %v400_v60, %v395_v6  ;;  %v405_v10 = vmul.f32 %v401_v61, %v394_v5  ;;  %v429_v11 = vmul.f32 %v425_v62, %v420_v8  ;;  %v430_v14 = vmul.f32 %v426_v63, %v419_v7  ;;  %1716 = vmatpush1.bf16.msra.mxu1 %v1715_v1  ;;  %v486_v54 = vld [vmem:[#allocation3 + $0x88] sm:$0xff]  ;;  %v512_v1 = vld [vmem:[#allocation3 + $0xb0] sm:$0xff]  ;;  %v513_v2 = vld [vmem:[#allocation3 + $0xb8] sm:$0xff] }
 0x544   :  { %1718 = vmatprep.subr.bf16.mxu1 %v1717_v4  ;;  %v490_v62 = vmul.f32 %v486_v54, %v2011_v13  ;;  %v489_v63 = vmul.f32 %v485_v55, %v2009_v12  ;;  %v488_v3 = vld [vmem:[#allocation3 + $0x98] sm:$0xff] }
 0x545   :  { %v1731_v17 = vpack.c.bf16 %v429_v11, %v404_v9  ;;  %v442_v18 = vpop.permute.xlu0 %441  ;;  %v467_v19 = vpop.permute.xlu1 %466  ;;  %v1729_v20 = vpack.c.bf16 %v430_v14, %v405_v10  ;;  %v492_v12 = vmul.f32 %v488_v3, %v2039_v23 }
 0x546   :  { %v447_v21 = vsel %vm443_vm9, %v442_v18, %v436_v37  ;;  %v472_v22 = vsel %vm468_vm8, %v467_v19, %v461_v38  ;;  %v508_v38 = vsel %vm505_vm10, %v2092_v40, %v2090_v39 }
 0x547   :  { %v452_v26 = vmul.f32 %v448_v15, %v447_v21  ;;  %v477_v27 = vmul.f32 %v473_v16, %v472_v22  ;;  %1730 = vmatprep.subr.bf16.mxu0 %v1729_v20  ;;  %v514_v59 = vmul.f32 %v510_v48, %v508_v38  ;;  %v535_v16 = vld [vmem:[#allocation3 + $0xc0] sm:$0xff] }
 0x548   :  { %1732 = vmatpush1.bf16.msra.mxu0 %v1731_v17  ;;  %v536_v17 = vld [vmem:[#allocation3 + $0xc8] sm:$0xff] }
 0x549   :  { %v1719_v28 = vpack.c.bf16 %v477_v27, %v452_v26  ;;  %v440_v29 = vpop.permute.xlu0 %439  ;;  %v2121_v30 = vpop.permute.xlu1 %547  ;;  %v1723_v6 = vpack.c.bf16 %v514_v59, %v489_v63  ;;  %v538_v27 = vld [vmem:[#allocation3 + $0xd8] sm:$0xff]  ;;  %v587_v59 = vld [vmem:[#allocation3 + $0x110] sm:$0xff] }
 0x54a   :  { %v444_v33 = vsel %vm443_vm9, %v440_v29, %v442_v18  ;;  %v445_v34 = vsel %vm443_vm9, %v438_v41, %v440_v29  ;;  %v561_v18 = vld [vmem:[#allocation3 + $0xe8] sm:$0xff]  ;;  %v558_v20 = vsel %vm555_vm12, %v2121_v30, %v2098_v45 }
 0x54b   :  { %1720 = vmatpush1.bf16.msra.mxu1 %v1719_v28  ;;  %v454_v49 = vmul.f32 %v450_v31, %v445_v34  ;;  %v455_v50 = vmul.f32 %v451_v32, %v444_v33  ;;  %v537_v32 = vld [vmem:[#allocation3 + $0xd0] sm:$0xff] }
 0x54c   :  { %v562_v34 = vld [vmem:[#allocation3 + $0xf0] sm:$0xff] }
 0x54d   :  { %v465_v37 = vpop.permute.xlu1 %464  ;;  %v523_v41 = vpop.permute.xlu0 %522 }
 0x54e   :  { %v469_v46 = vsel %vm468_vm8, %v465_v37, %v467_v19  ;;  %v470_v47 = vsel %vm468_vm8, %v463_v43, %v465_v37  ;;  %v487_v43 = vld [vmem:[#allocation3 + $0x90] sm:$0xff]  ;;  %v560_v19 = vld [vmem:[#allocation3 + $0xe0] sm:$0xff] }
 0x54f   :  { %v479_v51 = vmul.f32 %v475_v35, %v470_v47  ;;  %v480_v52 = vmul.f32 %v476_v36, %v469_v46  ;;  %v491_v9 = vmul.f32 %v487_v43, %v2047_v25  ;;  %v564_v31 = vmul.f32 %v560_v19, %v558_v20  ;;  %v563_v35 = vld [vmem:[#allocation3 + $0xf8] sm:$0xff] }
 0x551   :  { %v1735_v56 = vpack.c.bf16 %v479_v51, %v454_v49  ;;  %v502_v57 = vpop.permute.xlu1 %501  ;;  %v1733_v58 = vpack.c.bf16 %v480_v52, %v455_v50  ;;  %v529_v7 = vpop.permute.xlu0 %528  ;;  %v586_v52 = vld [vmem:[#allocation3 + $0x108] sm:$0xff] }
 0x552   :  { %v507_v60 = vsel %vm505_vm10, %v2090_v39, %v502_v57 }
 0x553   :  { %v515_v61 = vmul.f32 %v511_v53, %v507_v60  ;;  %1734 = vmatprep.subr.bf16.mxu0 %v1733_v58  ;;  %v588_v60 = vld [vmem:[#allocation3 + $0x118] sm:$0xff] }
 0x554   :  { %1736 = vmatpush1.bf16.msra.mxu0 %v1735_v56 }
 0x555   :  { %v504_v4 = vpop.permute.xlu1 %503  ;;  %v1721_v5 = vpack.c.bf16 %v515_v61, %v490_v62  ;;  %v575_v25 = vpop.permute.xlu0 %574  ;;  %v597_v61 = vld [vmem:[%s2525_s2] sm:$0xff] }
 0x556   :  { %v506_v8 = vsel %vm505_vm10, %v502_v57, %v504_v4  ;;  %v509_v39 = vsel %vm505_vm10, %v504_v4, %v2092_v40  ;;  %v533_v40 = vsel %vm530_vm11, %v523_v41, %v2094_v42 }
 0x557   :  { %v516_v13 = vmul.f32 %v512_v1, %v506_v8  ;;  %v517_v10 = vmul.f32 %v513_v2, %v509_v39  ;;  %1722 = vmatprep.subr.bf16.mxu1 %v1721_v5  ;;  %v539_v22 = vmul.f32 %v535_v16, %v533_v40 }
 0x558   :  { %1724 = vmatpush1.bf16.msra.mxu1 %v1723_v6 }
 0x559   :  { %v1739_v11 = vpack.c.bf16 %v516_v13, %v491_v9  ;;  %v527_v14 = vpop.permute.xlu1 %526  ;;  %v1737_v15 = vpack.c.bf16 %v517_v10, %v492_v12  ;;  %v1727_v38 = vpack.c.bf16 %v564_v31, %v539_v22  ;;  %v573_v46 = vpop.permute.xlu0 %572 }
 0x55a   :  { %v532_v23 = vsel %vm530_vm11, %v2094_v42, %v527_v14  ;;  %v534_v42 = vsel %vm530_vm11, %v529_v7, %v523_v41  ;;  %v531_v33 = vsel %vm530_vm11, %v527_v14, %v529_v7  ;;  %v585_v41 = vld [vmem:[#allocation3 + $0x100] sm:$0xff]  ;;  %v583_v53 = vsel %vm580_vm13, %v573_v46, %v575_v25 }
 0x55b   :  { %1738 = vmatprep.subr.bf16.mxu0 %v1737_v15  ;;  %v540_v28 = vmul.f32 %v536_v17, %v532_v23  ;;  %v542_v48 = vmul.f32 %v538_v27, %v534_v42  ;;  %v541_v49 = vmul.f32 %v537_v32, %v531_v33 }
 0x55c   :  { %1740 = vmatpush1.bf16.msra.mxu0 %v1739_v11 }
 0x55d   :  { %v552_v21 = vpop.permute.xlu1 %551 }
 0x55e   :  { %v557_v26 = vsel %vm555_vm12, %v2098_v45, %v552_v21 }
 0x55f   :  { %v565_v29 = vmul.f32 %v561_v18, %v557_v26 }
 0x561   :  { %v554_v36 = vpop.permute.xlu1 %553  ;;  %v1725_v37 = vpack.c.bf16 %v565_v29, %v540_v28  ;;  %v60_v28 = vld [vmem:[%s2527_s4 + $0x10] sm:$0xff] }
 0x562   :  { %v556_v45 = vsel %vm555_vm12, %v552_v21, %v554_v36  ;;  %v559_v47 = vsel %vm555_vm12, %v554_v36, %v2121_v30  ;;  %v589_v30 = vmul.f32 %v585_v41, %v583_v53 }
 0x563   :  { %v566_v50 = vmul.f32 %v562_v34, %v556_v45  ;;  %v567_v51 = vmul.f32 %v563_v35, %v559_v47  ;;  %1726 = vmatprep.subr.bf16.mxu1 %v1725_v37  ;;  %v61_v34 = vld [vmem:[%s2527_s4 + $0x18] sm:$0xff] }
 0x564   :  { %1728 = vmatpush1.bf16.msra.mxu1 %v1727_v38 }
 0x565   :  { %v1743_v54 = vpack.c.bf16 %v566_v50, %v541_v49  ;;  %v577_v55 = vpop.permute.xlu1 %576  ;;  %v1741_v56 = vpack.c.bf16 %v567_v51, %v542_v48 }
 0x566   :  { %v582_v57 = vsel %vm580_vm13, %v575_v25, %v577_v55 }
 0x567   :  { %v590_v58 = vmul.f32 %v586_v52, %v582_v57  ;;  %1742 = vmatprep.subr.bf16.mxu0 %v1741_v56  ;;  %v936_v56 = vld [vmem:[%s2526_s3 + $0x10] sm:$0xff]  ;;  %v937_v57 = vld [vmem:[%s2526_s3 + $0x18] sm:$0xff] }
 0x568   :  { %1744 = vmatpush1.bf16.msra.mxu0 %v1743_v54  ;;  %v934_v54 = vld [vmem:[%s2526_s3] sm:$0xff] }
 0x569   :  { %654 = vmatprep.subr.mxu1 %v590_v58  ;;  %v579_v43 = vpop.permute.xlu1 %578 }
 0x56a   :  { %v581_v62 = vsel %vm580_vm13, %v577_v55, %v579_v43  ;;  %v584_v63 = vsel %vm580_vm13, %v579_v43, %v573_v46  ;;  %655 = vmatpush1.msra.mxu1 %v589_v30  ;;  %v935_v55 = vld [vmem:[%s2526_s3 + $0x8] sm:$0xff] }
 0x56b   :  { %v591_v1 = vmul.f32 %v587_v59, %v581_v62  ;;  %v592_v2 = vmul.f32 %v588_v60, %v584_v63  ;;  %1638 = vmatmul.mubr.msk.f32.vlgmr.msra.gmra.mrb[4].mxu1 %vm634_vm14, %v597_v61  ;;  %1678 = vmatprep.subr.mxu1 %v1837_v0 }
 0x56c   :  { %1680 = vmatprep.mubr.msk.f32.mxu1 %vm1838_vm1, %v1837_v0 }
 0x56d   :  { %725 = vmatprep.subr.mxu0 %v592_v2 }
 0x56e   :  { %726 = vmatpush1.msra.mxu0 %v591_v1 }
 0x56f   :  { %1639 = vmatmul.mubr.msk.f32.vlgmr.msra.gmra.mrb[2].mxu0 %vm634_vm14, %v597_v61 }
 0x570   :  { %1014 = vmatprep.mubr.f32.mxu0 %v1837_v0 }
 0x63e   :  { %v704_v3 = vpop.f32.mrb[4].mxu1 }
 0x63f   :  { %v706_v4 = vpop.f32.mrb[5].mxu1  ;;  %v783_v5 = vmul.f32 %v704_v3, %v704_v3 }
 0x640   :  { %v780_v6 = vadd.f32 %v706_v4, %v704_v3  ;;  %v784_v24 = vmul.f32 %v706_v4, %v706_v4 }
 0x642   :  { %v2188_v7 = vpop.f32.mrb[2].mxu0  ;;  %781 = vadd.xlane.f32.xlu0 %v780_v6  ;;  %v785_v8 = vadd.f32 %v784_v24, %v783_v5 }
 0x643   :  { %v2190_v39 = vpop.f32.mrb[3].mxu0  ;;  %v791_v9 = vmul.f32 %v2188_v7, %v2188_v7 }
 0x644   :  { %786 = vadd.xlane.f32.xlu1 %v785_v8  ;;  %v788_v13 = vadd.f32 %v2190_v39, %v2188_v7  ;;  %v792_v10 = vmul.f32 %v2190_v39, %v2190_v39 }
 0x646   :  { %789 = vadd.xlane.f32.xlu0 %v788_v13  ;;  %v793_v12 = vadd.f32 %v792_v10, %v791_v9 }
 0x64a   :  { %794 = vadd.xlane.f32.xlu0 %v793_v12 }
 0x6cf   :  { %v782_v11 = vpop.xlane.xlu0 %781 }
 0x6d1   :  { %v787_v14 = vpop.xlane.xlu1 %786 }
 0x6d2   :  { %v796_v16 = vsel %vm238_vm2, %v782_v11, %v787_v14 }
 0x6d3   :  { %v790_v15 = vpop.xlane.xlu0 %789 }
 0x6d4   :  { %v797_v40 = vsel %vm240_vm3, %v796_v16, %v790_v15 }
 0x6d7   :  { %v795_v25 = vpop.xlane.xlu0 %794 }
 0x6d8   :  { %v798_v17 = vsel %vm242_vm4, %v797_v40, %v795_v25 }
 0x6d9   :  { %1679 = vmatpush3.msra.mxu1 %v798_v17 }
 0x6da   :  { %1681 = vmatmul.mubr.msk.f32.vlgmr.msra.gmra.mrb[6].mxu1 %vm244_vm5, %v1990_v44 }
 0x6db   :  { %1103 = vmatprep.mubr.f32.mxu1 %v1837_v0 }
 0x7ad   :  { %v865_v23 = vpop.f32.mrb[6].mxu1 }
 0x7ae   :  { %v1682_v18 = vpop.f32.mrb[7].mxu1  ;;  %v869_v19 = vmul.f32 %v865_v23, %v865_v23 }
 0x7b0   :  { %871 = vrot.lane.b32.xlu0 %v869_v19, %s1839_s26 }
 0x822   :  { %v872_v20 = vpop.permute.xlu0 %871 }
 0x823   :  { %v874_v21 = vsub.f32 %v865_v23, %v872_v20 }
 0x825   :  { %v875_v22 = vmul.f32 1.0019569, %v874_v21 }
 0x827   :  { %v876_v26 = vmax.f32 %v875_v22, 1e-20 }
 0x829   :  { %1776 = vrsqrt.f32 %v876_v26 }
 0x833   :  { %v1777_v27 = vpop.eup %1776 }
 0x834   :  { %899 = vrot.lane.b32.xlu1 %v1777_v27, %s1840_s27 }
 0x8a6   :  { %v900_v44 = vpop.permute.xlu1 %899 }
 0x8a7   :  { %v902_v29 = vmul.f32 %v900_v44, %v60_v28 }
 0x8a9   :  { %904 = vrot.lane.b32.xlu1 %v902_v29, %s1842_s30 }
 0x8ad   :  { %879 = vrot.lane.b32.xlu1 %v1777_v27, %s1843_s8 }
 0x91b   :  { %v905_v31 = vpop.permute.xlu1 %904 }
 0x91c   :  { %v907_v42 = vmul.f32 %v905_v31, %v865_v23 }
 0x91e   :  { %909 = vrot.lane.b32.xlu0 %v907_v42, %s1844_s9 }
 0x91f   :  { %v880_v32 = vpop.permute.xlu1 %879 }
 0x920   :  { %v882_v33 = vmul.f32 %v880_v32, %v60_v28 }
 0x922   :  { %v883_v35 = vmul.f32 %v882_v33, %v865_v23  ;;  %887 = vperm.xlu1 %1772, %v882_v33  }
 0x924   :  { %v884_v36 = vsub.f32 %v61_v34, %v883_v35 }
 0x926   :  { %914 = vperm.xlu1 %1772, %v902_v29   ;;  %894 = vperm.xlu0 %1773, %v884_v36  }
 0x990   :  { %v910_v37 = vpop.permute.xlu0 %909 }
 0x991   :  { %v912_v38 = vsub.f32 %v61_v34, %v910_v37 }
 0x993   :  { %921 = vperm.xlu0 %1773, %v912_v38  }
 0x9a1   :  { %v888_v46 = vpop.permute.xlu1 %887 }
 0x9a2   :  { %v890_v45 = vmul.f32 %v888_v46, %v704_v3  ;;  %v891_v47 = vmul.f32 %v888_v46, %v706_v4 }
 0x9a5   :  { %v895_v48 = vpop.permute.xlu0 %894  ;;  %v915_v58 = vpop.permute.xlu1 %914 }
 0x9a6   :  { %v897_v49 = vadd.f32 %v895_v48, %v890_v45  ;;  %v898_v50 = vadd.f32 %v895_v48, %v891_v47  ;;  %v917_v30 = vmul.f32 %v915_v58, %v2188_v7  ;;  %v918_v59 = vmul.f32 %v915_v58, %v2190_v39 }
 0x9a8   :  { %v926_v51 = vmul.f32 0.2, %v897_v49  ;;  %v927_v52 = vmul.f32 0.2, %v898_v50 }
 0x9aa   :  { %v930_v41 = vmax.f32 %v897_v49, %v926_v51  ;;  %v931_v53 = vmax.f32 %v898_v50, %v927_v52 }
 0x9ac   :  { %950 = vmatprep.subr.mxu0 %v931_v53 }
 0x9ad   :  { %951 = vmatpush1.msra.mxu0 %v930_v41  ;;  %v70_v41 = vld [vmem:[%s2528_s5] sm:$0xff] }
 0x9ae   :  { %1641 = vmatmul.mubr.msk.f32.vlgmr.msra.gmra.mrb[4].mxu0 %vm244_vm5, %v934_v54 }
 0x9af   :  { %1020 = vmatprep.mubr.f32.mxu0 %v1837_v0 }
 0x9b2   :  { %1642 = vmatmul.mubr.msk.f32.gmra.mrb[6].mxu0 %vm244_vm5, %v935_v55 }
 0x9b3   :  { %1026 = vmatprep.mubr.f32.mxu0 %v1837_v0 }
 0x9b6   :  { %1643 = vmatmul.mubr.msk.f32.gmra.mrb[8].mxu0 %vm244_vm5, %v936_v56 }
 0x9b7   :  { %1032 = vmatprep.mubr.f32.mxu0 %v1837_v0 }
 0x9ba   :  { %1644 = vmatmul.mubr.msk.f32.gmra.mrb[10].mxu0 %vm244_vm5, %v937_v57 }
 0x9bb   :  { %1691 = vmatprep.mubr.msk.f32.mxu0 %vm76_vm0, %v70_v41 }
 0xa12   :  { %v922_v60 = vpop.permute.xlu0 %921 }
 0xa13   :  { %v924_v61 = vadd.f32 %v922_v60, %v917_v30  ;;  %v925_v43 = vadd.f32 %v922_v60, %v918_v59 }
 0xa15   :  { %v928_v62 = vmul.f32 0.2, %v924_v61  ;;  %v929_v63 = vmul.f32 0.2, %v925_v43 }
 0xa17   :  { %v932_v1 = vmax.f32 %v924_v61, %v928_v62  ;;  %v933_v2 = vmax.f32 %v925_v43, %v929_v63 }
 0xa19   :  { %1039 = vmatprep.subr.mxu1 %v933_v2 }
 0xa1a   :  { %1040 = vmatpush1.msra.mxu1 %v932_v1 }
 0xa1b   :  { %1645 = vmatmul.mubr.msk.f32.vlgmr.msra.gmra.mrb[8].mxu1 %vm244_vm5, %v934_v54 }
 0xa1c   :  { %1109 = vmatprep.mubr.f32.mxu1 %v1837_v0 }
 0xa1f   :  { %1646 = vmatmul.mubr.msk.f32.gmra.mrb[10].mxu1 %vm244_vm5, %v935_v55 }
 0xa20   :  { %1115 = vmatprep.mubr.f32.mxu1 %v1837_v0 }
 0xa23   :  { %1647 = vmatmul.mubr.msk.f32.gmra.mrb[12].mxu1 %vm244_vm5, %v936_v56 }
 0xa24   :  { %1121 = vmatprep.mubr.f32.mxu1 %v1837_v0 }
 0xa27   :  { %1648 = vmatmul.mubr.msk.f32.gmra.mrb[14].mxu1 %vm244_vm5, %v937_v57 }
 0xa81   :  { %v2243_v3 = vpop.f32.mrb[4].mxu0 }
 0xa82   :  { %v2245_v4 = vpop.f32.mrb[5].mxu0  ;;  %v1140_v5 = vmul.f32 %v2243_v3, %v2243_v3 }
 0xa83   :  { %v1141_v6 = vmul.f32 %v2245_v4, %v2245_v4  ;;  %v1128_v24 = vadd.f32 %v2245_v4, %v2243_v3 }
 0xa85   :  { %v1148_v7 = vadd.f32 %v1141_v6, %v1140_v5  ;;  %v2253_v8 = vpop.f32.mrb[6].mxu0  ;;  %1129 = vadd.xlane.f32.xlu1 %v1128_v24 }
 0xa86   :  { %v2255_v0 = vpop.f32.mrb[7].mxu0  ;;  %v1142_v39 = vmul.f32 %v2253_v8, %v2253_v8 }
 0xa87   :  { %1149 = vadd.xlane.f32.xlu0 %v1148_v7  ;;  %v1131_v9 = vadd.f32 %v2255_v0, %v2253_v8  ;;  %v1143_v13 = vmul.f32 %v2255_v0, %v2255_v0 }
 0xa89   :  { %v2263_v10 = vpop.f32.mrb[8].mxu0  ;;  %v1151_v12 = vadd.f32 %v1143_v13, %v1142_v39 }
 0xa8a   :  { %v2265_v11 = vpop.f32.mrb[9].mxu0  ;;  %v1144_v14 = vmul.f32 %v2263_v10, %v2263_v10 }
 0xa8b   :  { %1132 = vadd.xlane.f32.xlu0 %v1131_v9  ;;  %v1134_v15 = vadd.f32 %v2265_v11, %v2263_v10  ;;  %v1145_v16 = vmul.f32 %v2265_v11, %v2265_v11 }
 0xa8d   :  { %1135 = vadd.xlane.f32.xlu1 %v1134_v15  ;;  %v2273_v40 = vpop.f32.mrb[10].mxu0  ;;  %v1154_v25 = vadd.f32 %v1145_v16, %v1144_v14 }
 0xa8e   :  { %v2275_v17 = vpop.f32.mrb[11].mxu0  ;;  %v1146_v23 = vmul.f32 %v2273_v40, %v2273_v40 }
 0xa8f   :  { %1152 = vadd.xlane.f32.xlu0 %v1151_v12  ;;  %v1137_v18 = vadd.f32 %v2275_v17, %v2273_v40  ;;  %v1147_v19 = vmul.f32 %v2275_v17, %v2275_v17 }
 0xa91   :  { %1155 = vadd.xlane.f32.xlu1 %v1154_v25  ;;  %v1157_v20 = vadd.f32 %v1147_v19, %v1146_v23 }
 0xa93   :  { %1138 = vadd.xlane.f32.xlu0 %v1137_v18 }
 0xa97   :  { %1158 = vadd.xlane.f32.xlu0 %v1157_v20  ;;  %v71_v20 = vld [vmem:[%s2528_s5 + $0x8] sm:$0xff] }
 0xaee   :  { %v2283_v21 = vpop.f32.mrb[8].mxu1 }
 0xaef   :  { %v2285_v22 = vpop.f32.mrb[9].mxu1  ;;  %v1172_v26 = vmul.f32 %v2283_v21, %v2283_v21 }
 0xaf0   :  { %v1160_v27 = vadd.f32 %v2285_v22, %v2283_v21  ;;  %v1173_v28 = vmul.f32 %v2285_v22, %v2285_v22 }
 0xaf2   :  { %1161 = vadd.xlane.f32.xlu1 %v1160_v27  ;;  %v2293_v44 = vpop.f32.mrb[10].mxu1  ;;  %v1180_v29 = vadd.f32 %v1173_v28, %v1172_v26  ;;  %v72_v26 = vld [vmem:[%s2528_s5 + $0x10] sm:$0xff]  ;;  %v73_v27 = vld [vmem:[%s2528_s5 + $0x18] sm:$0xff] }
 0xaf3   :  { %v2295_v31 = vpop.f32.mrb[11].mxu1  ;;  %v1174_v42 = vmul.f32 %v2293_v44, %v2293_v44 }
 0xaf4   :  { %v1163_v32 = vadd.f32 %v2295_v31, %v2293_v44  ;;  %v1175_v33 = vmul.f32 %v2295_v31, %v2295_v31 }
 0xaf6   :  { %1181 = vadd.xlane.f32.xlu1 %v1180_v29  ;;  %1164 = vadd.xlane.f32.xlu0 %v1163_v32  ;;  %v2303_v34 = vpop.f32.mrb[12].mxu1  ;;  %v1183_v35 = vadd.f32 %v1175_v33, %v1174_v42 }
 0xaf7   :  { %v2305_v36 = vpop.f32.mrb[13].mxu1  ;;  %v1176_v37 = vmul.f32 %v2303_v34, %v2303_v34 }
 0xaf8   :  { %v1166_v38 = vadd.f32 %v2305_v36, %v2303_v34  ;;  %v1177_v46 = vmul.f32 %v2305_v36, %v2305_v36 }
 0xafa   :  { %1184 = vadd.xlane.f32.xlu0 %v1183_v35  ;;  %1167 = vadd.xlane.f32.xlu1 %v1166_v38  ;;  %v2313_v45 = vpop.f32.mrb[14].mxu1  ;;  %v1186_v47 = vadd.f32 %v1177_v46, %v1176_v37 }
 0xafb   :  { %v2315_v48 = vpop.f32.mrb[15].mxu1  ;;  %v1178_v49 = vmul.f32 %v2313_v45, %v2313_v45 }
 0xafc   :  { %v1179_v50 = vmul.f32 %v2315_v48, %v2315_v48  ;;  %v1169_v51 = vadd.f32 %v2315_v48, %v2313_v45 }
 0xafe   :  { %1187 = vadd.xlane.f32.xlu1 %v1186_v47  ;;  %1170 = vadd.xlane.f32.xlu0 %v1169_v51  ;;  %v1189_v52 = vadd.f32 %v1179_v50, %v1178_v49 }
 0xb02   :  { %1190 = vadd.xlane.f32.xlu0 %v1189_v52 }
 0xb12   :  { %v1130_v55 = vpop.xlane.xlu1 %1129 }
 0xb14   :  { %v1150_v53 = vpop.xlane.xlu0 %1149 }
 0xb15   :  { %v1192_v62 = vsel %vm238_vm2, %v1130_v55, %v1150_v53 }
 0xb18   :  { %v1133_v54 = vpop.xlane.xlu0 %1132 }
 0xb1a   :  { %v1136_v57 = vpop.xlane.xlu1 %1135 }
 0xb1c   :  { %v1153_v56 = vpop.xlane.xlu0 %1152 }
 0xb1d   :  { %v1193_v63 = vsel %vm238_vm2, %v1133_v54, %v1153_v56 }
 0xb1e   :  { %v1156_v30 = vpop.xlane.xlu1 %1155 }
 0xb1f   :  { %v1194_v12 = vsel %vm238_vm2, %v1136_v57, %v1156_v30 }
 0xb20   :  { %v1139_v58 = vpop.xlane.xlu0 %1138 }
 0xb24   :  { %v1159_v59 = vpop.xlane.xlu0 %1158 }
 0xb25   :  { %v1195_v14 = vsel %vm238_vm2, %v1139_v58, %v1159_v59 }
 0xb7f   :  { %v1162_v60 = vpop.xlane.xlu1 %1161 }
 0xb80   :  { %v1196_v1 = vsel %vm240_vm3, %v1192_v62, %v1162_v60 }
 0xb83   :  { %v1182_v61 = vpop.xlane.xlu1 %1181  ;;  %v1165_v43 = vpop.xlane.xlu0 %1164 }
 0xb84   :  { %v1197_v2 = vsel %vm240_vm3, %v1193_v63, %v1165_v43  ;;  %v1200_v24 = vsel %vm242_vm4, %v1196_v1, %v1182_v61  ;;  %v63_v1 = vld [vmem:[%s2527_s4 + $0x28] sm:$0xff] }
 0xb87   :  { %v1185_v5 = vpop.xlane.xlu0 %1184  ;;  %v1168_v6 = vpop.xlane.xlu1 %1167 }
 0xb88   :  { %v1201_v7 = vsel %vm242_vm4, %v1197_v2, %v1185_v5  ;;  %v1198_v15 = vsel %vm240_vm3, %v1194_v12, %v1168_v6  ;;  %v62_v2 = vld [vmem:[%s2527_s4 + $0x20] sm:$0xff]  ;;  %v65_v12 = vld [vmem:[%s2527_s4 + $0x38] sm:$0xff] }
 0xb89   :  { %v1745_v39 = vpack.c.bf16 %v1201_v7, %v1200_v24 }
 0xb8b   :  { %1746 = vmatprep.subr.bf16.mxu0 %v1745_v39  ;;  %v1171_v9 = vpop.xlane.xlu0 %1170  ;;  %v1188_v13 = vpop.xlane.xlu1 %1187 }
 0xb8c   :  { %1748 = vmatpush3.bf16.msra.mxu0 %v1745_v39  ;;  %v1199_v16 = vsel %vm240_vm3, %v1195_v14, %v1171_v9  ;;  %v1202_v23 = vsel %vm242_vm4, %v1198_v15, %v1188_v13  ;;  %v64_v39 = vld [vmem:[%s2527_s4 + $0x30] sm:$0xff] }
 0xb8f   :  { %v1191_v25 = vpop.xlane.xlu0 %1190 }
 0xb90   :  { %v1203_v18 = vsel %vm242_vm4, %v1199_v16, %v1191_v25 }
 0xb91   :  { %v1749_v19 = vpack.c.bf16 %v1203_v18, %v1202_v23 }
 0xb93   :  { %1750 = vmatprep.subr.bf16.mxu0 %v1749_v19 }
 0xb94   :  { %1752 = vmatpush3.bf16.msra.mxu0 %v1749_v19 }
 0xb97   :  { %1692 = vmatmul.mubr.msk.f32.vlgmr.msra.gmra.mrb[12].mxu0 %vm76_vm0, %v71_v20 }
 0xb98   :  { %1694 = vmatprep.mubr.msk.f32.mxu0 %vm76_vm0, %v72_v26 }
 0xb9b   :  { %1695 = vmatmul.mubr.msk.f32.gmra.mrb[14].mxu0 %vm76_vm0, %v73_v27 }
 0xc6a   :  { %v2351_v28 = vpop.f32.mrb[12].mxu0 }
 0xc6b   :  { %v2353_v29 = vpop.f32.mrb[13].mxu0  ;;  %v1302_v42 = vmul.f32 %v2351_v28, %v2351_v28 }
 0xc6c   :  { %v1301_v32 = vmul.f32 %v2353_v29, %v2353_v29 }
 0xc6d   :  { %1311 = vrot.lane.b32.xlu0 %v1302_v42, %s1839_s26 }
 0xc6e   :  { %1309 = vrot.lane.b32.xlu1 %v1301_v32, %s1839_s26  ;;  %v2361_v33 = vpop.f32.mrb[14].mxu0 }
 0xc6f   :  { %v2363_v35 = vpop.f32.mrb[15].mxu0  ;;  %v1304_v38 = vmul.f32 %v2361_v33, %v2361_v33 }
 0xc70   :  { %v1303_v37 = vmul.f32 %v2363_v35, %v2363_v35 }
 0xc72   :  { %1313 = vrot.lane.b32.xlu1 %v1303_v37, %s1839_s26 }
 0xc76   :  { %1315 = vrot.lane.b32.xlu1 %v1304_v38, %s1839_s26 }
 0xcdf   :  { %v1312_v46 = vpop.permute.xlu0 %1311 }
 0xce0   :  { %v1322_v47 = vsub.f32 %v2351_v28, %v1312_v46  ;;  %v1310_v49 = vpop.permute.xlu1 %1309 }
 0xce1   :  { %v1321_v50 = vsub.f32 %v2353_v29, %v1310_v49 }
 0xce2   :  { %v1326_v51 = vmul.f32 1.0004885, %v1322_v47 }
 0xce3   :  { %v1325_v52 = vmul.f32 1.0004885, %v1321_v50 }
 0xce4   :  { %v1330_v41 = vmax.f32 %v1326_v51, 1e-20  ;;  %v1314_v53 = vpop.permute.xlu1 %1313 }
 0xce5   :  { %v1329_v54 = vmax.f32 %v1325_v52, 1e-20  ;;  %v1323_v55 = vsub.f32 %v2363_v35, %v1314_v53  ;;  %v66_v52 = vld [vmem:[%s2527_s4 + $0x40] sm:$0xff] }
 0xce6   :  { %1778 = vrsqrt.f32 %v1330_v41 }
 0xce7   :  { %1780 = vrsqrt.f32 %v1329_v54  ;;  %v1327_v56 = vmul.f32 1.0004885, %v1323_v55  ;;  %v67_v55 = vld [vmem:[%s2527_s4 + $0x48] sm:$0xff] }
 0xce8   :  { %v1316_v57 = vpop.permute.xlu1 %1315 }
 0xce9   :  { %v1331_v58 = vmax.f32 %v1327_v56, 1e-20  ;;  %v1324_v30 = vsub.f32 %v2361_v33, %v1316_v57  ;;  %v68_v56 = vld [vmem:[%s2527_s4 + $0x50] sm:$0xff] }
 0xceb   :  { %1782 = vrsqrt.f32 %v1331_v58  ;;  %v1328_v59 = vmul.f32 1.0004885, %v1324_v30 }
 0xced   :  { %v1332_v60 = vmax.f32 %v1328_v59, 1e-20 }
 0xcef   :  { %1784 = vrsqrt.f32 %v1332_v60 }
 0xcf0   :  { %v1779_v61 = vpop.eup %1778 }
 0xcf1   :  { %v1781_v43 = vpop.eup %1780  ;;  %1423 = vrot.lane.b32.xlu0 %v1779_v61, %s1840_s27 }
 0xcf2   :  { %1421 = vrot.lane.b32.xlu1 %v1781_v43, %s1840_s27 }
 0xcf5   :  { %v1783_v62 = vpop.eup %1782 }
 0xcf6   :  { %1425 = vrot.lane.b32.xlu1 %v1783_v62, %s1840_s27 }
 0xcf9   :  { %v1785_v63 = vpop.eup %1784 }
 0xcfa   :  { %1427 = vrot.lane.b32.xlu0 %v1785_v63, %s1840_s27 }
 0xd63   :  { %v1424_v5 = vpop.permute.xlu0 %1423 }
 0xd64   :  { %v1434_v6 = vmul.f32 %v1424_v5, %v63_v1  ;;  %v1422_v24 = vpop.permute.xlu1 %1421 }
 0xd65   :  { %v1433_v7 = vmul.f32 %v1422_v24, %v62_v2 }
 0xd66   :  { %1443 = vrot.lane.b32.xlu0 %v1434_v6, %s1842_s30 }
 0xd67   :  { %1441 = vrot.lane.b32.xlu1 %v1433_v7, %s1842_s30 }
 0xd68   :  { %v1426_v9 = vpop.permute.xlu1 %1425 }
 0xd69   :  { %v1435_v13 = vmul.f32 %v1426_v9, %v64_v39 }
 0xd6b   :  { %1445 = vrot.lane.b32.xlu1 %v1435_v13, %s1842_s30 }
 0xd6c   :  { %v1428_v14 = vpop.permute.xlu0 %1427 }
 0xd6d   :  { %v1436_v15 = vmul.f32 %v1428_v14, %v65_v12 }
 0xd6f   :  { %1447 = vrot.lane.b32.xlu0 %v1436_v15, %s1842_s30  ;;  %1341 = vrot.lane.b32.xlu1 %v1781_v43, %s1843_s8 }
 0xd73   :  { %1343 = vrot.lane.b32.xlu0 %v1779_v61, %s1843_s8  ;;  %1345 = vrot.lane.b32.xlu1 %v1783_v62, %s1843_s8 }
 0xd77   :  { %1347 = vrot.lane.b32.xlu0 %v1785_v63, %s1843_s8 }
 0xdd8   :  { %v1444_v16 = vpop.permute.xlu0 %1443 }
 0xdd9   :  { %v1454_v25 = vmul.f32 %v2351_v28, %v1444_v16  ;;  %v1442_v23 = vpop.permute.xlu1 %1441 }
 0xdda   :  { %v1453_v18 = vmul.f32 %v1442_v23, %v2353_v29  ;;  %v1529_v23 = vld [vmem:[%s2523_s0] sm:$0xff] }
 0xddb   :  { %1463 = vrot.lane.b32.xlu0 %v1454_v25, %s1844_s9 }
 0xddc   :  { %1461 = vrot.lane.b32.xlu1 %v1453_v18, %s1844_s9 }
 0xddd   :  { %v1446_v19 = vpop.permute.xlu1 %1445 }
 0xdde   :  { %v1455_v20 = vmul.f32 %v1446_v19, %v2363_v35 }
 0xde0   :  { %1465 = vrot.lane.b32.xlu1 %v1455_v20, %s1844_s9 }
 0xde1   :  { %v1448_v26 = vpop.permute.xlu0 %1447  ;;  %v1342_v27 = vpop.permute.xlu1 %1341 }
 0xde2   :  { %v1456_v42 = vmul.f32 %v2361_v33, %v1448_v26  ;;  %v1353_v32 = vmul.f32 %v1342_v27, %v62_v2 }
 0xde4   :  { %1467 = vrot.lane.b32.xlu0 %v1456_v42, %s1844_s9  ;;  %1367 = vperm.xlu1 %1772, %v1353_v32   ;;  %v1357_v51 = vmul.f32 %v1353_v32, %v2353_v29 }
 0xde5   :  { %v1344_v37 = vpop.permute.xlu0 %1343  ;;  %v1346_v38 = vpop.permute.xlu1 %1345 }
 0xde6   :  { %v1354_v46 = vmul.f32 %v1344_v37, %v63_v1  ;;  %v1355_v47 = vmul.f32 %v1346_v38, %v64_v39  ;;  %v1361_v41 = vsub.f32 %v66_v52, %v1357_v51 }
 0xde8   :  { %1372 = vperm.xlu0 %1773, %v1354_v46   ;;  %1377 = vperm.xlu1 %1772, %v1355_v47   ;;  %v1358_v53 = vmul.f32 %v2351_v28, %v1354_v46  ;;  %v1359_v54 = vmul.f32 %v1355_v47, %v2363_v35  ;;  %v69_v28 = vld [vmem:[%s2527_s4 + $0x58] sm:$0xff] }
 0xde9   :  { %v1348_v49 = vpop.permute.xlu0 %1347 }
 0xdea   :  { %v1356_v50 = vmul.f32 %v1348_v49, %v65_v12  ;;  %v1362_v29 = vsub.f32 %v67_v55, %v1358_v53  ;;  %v1363_v57 = vsub.f32 %v68_v56, %v1359_v54 }
 0xdec   :  { %1382 = vperm.xlu0 %1773, %v1356_v50   ;;  %1478 = vperm.xlu1 %1772, %v1433_v7   ;;  %v1360_v58 = vmul.f32 %v2361_v33, %v1356_v50 }
 0xdee   :  { %v1364_v35 = vsub.f32 %v69_v28, %v1360_v58 }
 0xdf0   :  { %1482 = vperm.xlu0 %1773, %v1434_v6   ;;  %1486 = vperm.xlu1 %1772, %v1435_v13  }
 0xdf4   :  { %1490 = vperm.xlu0 %1773, %v1436_v15   ;;  %1395 = vperm.xlu1 %1772, %v1361_v41  }
 0xdf8   :  { %1400 = vperm.xlu0 %1773, %v1362_v29   ;;  %1405 = vperm.xlu1 %1772, %v1363_v57   ;;  %v1535_v29 = vld [vmem:[%s2523_s0 + $0x30] sm:$0xff]  ;;  %v1536_v57 = vld [vmem:[%s2523_s0 + $0x38] sm:$0xff] }
 0xdfc   :  { %1410 = vperm.xlu0 %1773, %v1364_v35  }
 0xe4d   :  { %v1464_v30 = vpop.permute.xlu0 %1463 }
 0xe4e   :  { %v1474_v59 = vsub.f32 %v67_v55, %v1464_v30  ;;  %v1462_v60 = vpop.permute.xlu1 %1461 }
 0xe4f   :  { %v1473_v61 = vsub.f32 %v66_v52, %v1462_v60 }
 0xe50   :  { %1508 = vperm.xlu0 %1773, %v1474_v59  }
 0xe51   :  { %1503 = vperm.xlu1 %1772, %v1473_v61  }
 0xe52   :  { %v1466_v43 = vpop.permute.xlu1 %1465 }
 0xe53   :  { %v1475_v62 = vsub.f32 %v68_v56, %v1466_v43 }
 0xe55   :  { %1513 = vperm.xlu1 %1772, %v1475_v62  }
 0xe56   :  { %v1468_v63 = vpop.permute.xlu0 %1467 }
 0xe57   :  { %v1476_v1 = vsub.f32 %v69_v28, %v1468_v63 }
 0xe59   :  { %1518 = vperm.xlu0 %1773, %v1476_v1  }
 0xe63   :  { %v1368_v33 = vpop.permute.xlu1 %1367 }
 0xe64   :  { %v1386_v25 = vmul.f32 %v1368_v33, %v2245_v4 }
 0xe67   :  { %v1373_v2 = vpop.permute.xlu0 %1372  ;;  %v1378_v5 = vpop.permute.xlu1 %1377 }
 0xe68   :  { %v1387_v4 = vmul.f32 %v1373_v2, %v2253_v8  ;;  %v1388_v19 = vmul.f32 %v1373_v2, %v2255_v0  ;;  %v1389_v27 = vmul.f32 %v1378_v5, %v2263_v10  ;;  %v1390_v42 = vmul.f32 %v1378_v5, %v2265_v11  ;;  %v1533_v10 = vld [vmem:[%s2523_s0 + $0x20] sm:$0xff]  ;;  %v1534_v11 = vld [vmem:[%s2523_s0 + $0x28] sm:$0xff] }
 0xe6b   :  { %v1383_v6 = vpop.permute.xlu0 %1382  ;;  %v1479_v24 = vpop.permute.xlu1 %1478 }
 0xe6c   :  { %v2424_v7 = vmul.f32 %v1479_v24, %v2283_v21  ;;  %v2427_v39 = vmul.f32 %v1479_v24, %v2285_v22  ;;  %v1385_v21 = vmul.f32 %v1368_v33, %v2243_v3  ;;  %v1391_v47 = vmul.f32 %v1383_v6, %v2273_v40  ;;  %v1655_v24 = vld [vmem:[%s2523_s0 + $0x50] sm:$0xff] }
 0xe6d   :  { %v1392_v49 = vmul.f32 %v1383_v6, %v2275_v17 }
 0xe6f   :  { %v1483_v9 = vpop.permute.xlu0 %1482  ;;  %v1487_v13 = vpop.permute.xlu1 %1486 }
 0xe70   :  { %v2430_v12 = vmul.f32 %v1483_v9, %v2293_v44  ;;  %v2433_v14 = vmul.f32 %v1483_v9, %v2295_v31  ;;  %v2436_v15 = vmul.f32 %v1487_v13, %v2303_v34  ;;  %v2439_v16 = vmul.f32 %v1487_v13, %v2305_v36  ;;  %v1530_v44 = vld [vmem:[%s2523_s0 + $0x8] sm:$0xff]  ;;  %v1656_v9 = vld [vmem:[%s2523_s0 + $0x58] sm:$0xff] }
 0xe73   :  { %v1491_v22 = vpop.permute.xlu0 %1490  ;;  %v1396_v31 = vpop.permute.xlu1 %1395 }
 0xe74   :  { %v2450_v34 = vmul.f32 %v1491_v22, %v2313_v45  ;;  %v2453_v36 = vmul.f32 %v1491_v22, %v2315_v48  ;;  %v1413_v18 = vadd.f32 %v1396_v31, %v1385_v21  ;;  %v1414_v3 = vadd.f32 %v1396_v31, %v1386_v25  ;;  %v1531_v45 = vld [vmem:[%s2523_s0 + $0x10] sm:$0xff]  ;;  %v1532_v48 = vld [vmem:[%s2523_s0 + $0x18] sm:$0xff]  ;;  %v1653_v22 = vld [vmem:[%s2523_s0 + $0x40] sm:$0xff] }
 0xe76   :  { %v1537_v20 = vadd.f32 %v1529_v23, %v1413_v18  ;;  %v1538_v26 = vadd.f32 %v1530_v44, %v1414_v3  ;;  %v1654_v23 = vld [vmem:[%s2523_s0 + $0x48] sm:$0xff] }
 0xe77   :  { %v1401_v32 = vpop.permute.xlu0 %1400  ;;  %v1406_v37 = vpop.permute.xlu1 %1405 }
 0xe78   :  { %v1545_v38 = vmul.f32 0.2, %v1537_v20  ;;  %v1546_v8 = vmul.f32 0.2, %v1538_v26  ;;  %v1415_v46 = vadd.f32 %v1401_v32, %v1387_v4  ;;  %v1416_v0 = vadd.f32 %v1401_v32, %v1388_v19 }
 0xe79   :  { %v1417_v50 = vadd.f32 %v1406_v37, %v1389_v27  ;;  %v1418_v51 = vadd.f32 %v1406_v37, %v1390_v42  ;;  %v1658_v27 = vld [vmem:[%s2523_s0 + $0x68] sm:$0xff] }
 0xe7a   :  { %v1553_v52 = vmax.f32 %v1537_v20, %v1545_v38  ;;  %v1554_v41 = vmax.f32 %v1538_v26, %v1546_v8  ;;  %v1539_v53 = vadd.f32 %v1531_v45, %v1415_v46  ;;  %v1540_v54 = vadd.f32 %v1532_v48, %v1416_v0 }
 0xe7b   :  { %v1541_v55 = vadd.f32 %v1533_v10, %v1417_v50  ;;  %v1542_v56 = vadd.f32 %v1534_v11, %v1418_v51  ;;  %v1411_v58 = vpop.permute.xlu0 %1410  ;;  %v1659_v10 = vld [vmem:[%s2523_s0 + $0x70] sm:$0xff]  ;;  %v1660_v11 = vld [vmem:[%s2523_s0 + $0x78] sm:$0xff] }
 0xe7c   :  { %1561 = vst [vmem:[#allocation6] sm:$0xff] %v1553_v52  ;;  %1562 = vst [vmem:[#allocation6 + $0x8] sm:$0xff] %v1554_v41  ;;  %v1547_v40 = vmul.f32 0.2, %v1539_v53  ;;  %v1548_v17 = vmul.f32 0.2, %v1540_v54  ;;  %v1419_v28 = vadd.f32 %v1411_v58, %v1391_v47  ;;  %v1420_v35 = vadd.f32 %v1411_v58, %v1392_v49 }
 0xe7d   :  { %v1549_v30 = vmul.f32 0.2, %v1541_v55  ;;  %v1550_v59 = vmul.f32 0.2, %v1542_v56 }
 0xe7e   :  { %v1555_v60 = vmax.f32 %v1539_v53, %v1547_v40  ;;  %v1556_v61 = vmax.f32 %v1540_v54, %v1548_v17  ;;  %v1543_v43 = vadd.f32 %v1535_v29, %v1419_v28  ;;  %v1544_v62 = vadd.f32 %v1536_v57, %v1420_v35 }
 0xe7f   :  { %v1557_v63 = vmax.f32 %v1541_v55, %v1549_v30  ;;  %v1558_v1 = vmax.f32 %v1542_v56, %v1550_v59 }
 0xe80   :  { %1563 = vst [vmem:[#allocation6 + $0x10] sm:$0xff] %v1555_v60  ;;  %1564 = vst [vmem:[#allocation6 + $0x18] sm:$0xff] %v1556_v61  ;;  %v1551_v33 = vmul.f32 0.2, %v1543_v43  ;;  %v1552_v2 = vmul.f32 0.2, %v1544_v62 }
 0xe81   :  { %1565 = vst [vmem:[#allocation6 + $0x20] sm:$0xff] %v1557_v63  ;;  %1566 = vst [vmem:[#allocation6 + $0x28] sm:$0xff] %v1558_v1 }
 0xe82   :  { %v1559_v5 = vmax.f32 %v1543_v43, %v1551_v33  ;;  %v1560_v6 = vmax.f32 %v1544_v62, %v1552_v2 }
 0xe84   :  { %1567 = vst [vmem:[#allocation6 + $0x30] sm:$0xff] %v1559_v5  ;;  %1568 = vst [vmem:[#allocation6 + $0x38] sm:$0xff] %v1560_v6 }
 0xecf   :  { %v1509_v13 = vpop.permute.xlu0 %1508 }
 0xed0   :  { %v1523_v21 = vadd.f32 %v1509_v13, %v2430_v12  ;;  %v1524_v25 = vadd.f32 %v1509_v13, %v2433_v14  ;;  %v1504_v44 = vpop.permute.xlu1 %1503  ;;  %v1657_v14 = vld [vmem:[%s2523_s0 + $0x60] sm:$0xff]  ;;  %s1808_s0 = scalar_lea.vmem %s1616_s29, 2048 }
 0xed1   :  { %v1521_v31 = vadd.f32 %v1504_v44, %v2424_v7  ;;  %v1522_v18 = vadd.f32 %v1504_v44, %v2427_v39  ;;  %p1809_p8 = scmp.ne.s32.totalorder %s1616_s29, %s1808_s0  ;;  %p1814_p10 = scmp.lt.s32.totalorder %s1808_s0, %s1808_s0 }
 0xed2   :  { %v1579_v3 = vadd.f32 %v1655_v24, %v1523_v21  ;;  %v1580_v4 = vadd.f32 %v1656_v9, %v1524_v25 }
 0xed3   :  { %v1577_v19 = vadd.f32 %v1653_v22, %v1521_v31  ;;  %v1578_v20 = vadd.f32 %v1654_v23, %v1522_v18  ;;  %p1815_p11 = por %p1814_p10, %p1813_p9 }
 0xed4   :  { %v1587_v12 = vmul.f32 0.2, %v1579_v3  ;;  %v1588_v26 = vmul.f32 0.2, %v1580_v4  ;;  %v1514_v42 = vpop.permute.xlu1 %1513 }
 0xed5   :  { %v1585_v45 = vmul.f32 0.2, %v1577_v19  ;;  %v1586_v48 = vmul.f32 0.2, %v1578_v20  ;;  %v1525_v7 = vadd.f32 %v1514_v42, %v2436_v15  ;;  %v1526_v39 = vadd.f32 %v1514_v42, %v2439_v16  ;;  %p1816_p12 = pnand %p1815_p11, %p1809_p8 }
 0xed6   :  { %v1595_v32 = vmax.f32 %v1579_v3, %v1587_v12  ;;  %v1596_v37 = vmax.f32 %v1580_v4, %v1588_v26 }
 0xed7   :  { %v1593_v38 = vmax.f32 %v1577_v19, %v1585_v45  ;;  %v1594_v8 = vmax.f32 %v1578_v20, %v1586_v48  ;;  %v1581_v46 = vadd.f32 %v1657_v14, %v1525_v7  ;;  %v1582_v0 = vadd.f32 %v1658_v27, %v1526_v39 }
 0xed8   :  { %1604 = vst [vmem:[#allocation6 + $0x50] sm:$0xff] %v1595_v32  ;;  %1605 = vst [vmem:[#allocation6 + $0x58] sm:$0xff] %v1596_v37  ;;  %v1519_v47 = vpop.permute.xlu0 %1518 }
 0xed9   :  { %1602 = vst [vmem:[#allocation6 + $0x40] sm:$0xff] %v1593_v38  ;;  %1603 = vst [vmem:[#allocation6 + $0x48] sm:$0xff] %v1594_v8  ;;  %v1589_v15 = vmul.f32 0.2, %v1581_v46  ;;  %v1590_v16 = vmul.f32 0.2, %v1582_v0  ;;  %v1527_v49 = vadd.f32 %v1519_v47, %v2450_v34  ;;  %v1528_v50 = vadd.f32 %v1519_v47, %v2453_v36 }
 0xedb   :  { %v1597_v51 = vmax.f32 %v1581_v46, %v1589_v15  ;;  %v1598_v52 = vmax.f32 %v1582_v0, %v1590_v16  ;;  %v1583_v41 = vadd.f32 %v1659_v10, %v1527_v49  ;;  %v1584_v53 = vadd.f32 %v1660_v11, %v1528_v50 }
 0xedd   :  { %1606 = vst [vmem:[#allocation6 + $0x60] sm:$0xff] %v1597_v51  ;;  %1607 = vst [vmem:[#allocation6 + $0x68] sm:$0xff] %v1598_v52  ;;  %v1591_v54 = vmul.f32 0.2, %v1583_v41  ;;  %v1592_v55 = vmul.f32 0.2, %v1584_v53 }
 0xedf   :  { %v1599_v56 = vmax.f32 %v1583_v41, %v1591_v54  ;;  %v1600_v29 = vmax.f32 %v1584_v53, %v1592_v55 }
 0xee1   :  { %1608 = vst [vmem:[#allocation6 + $0x70] sm:$0xff] %v1599_v56  ;;  %1609 = vst [vmem:[#allocation6 + $0x78] sm:$0xff] %v1600_v29 }
 0xee2   :  { %1819 = shalt.err (!%p1816_p12)
}
 0xee3   :  { %s1820_s11 = scalar_lea.hbm %s2530_s7, 2048 }
 0xee4   :  { %p1821_p13 = scmp.ne.s32.totalorder %s2530_s7, %s1820_s11  ;;  %p1824_p0 = scmp.lt.u32.totalorder %s1820_s11, %s2530_s7 }
 0xee6   :  { %p1826_p1 = pnand %p1824_p0, %p1821_p13 }
 0xee8   :  { %1829 = shalt.err (!%p1826_p1)
}
 0xee9   :  { %s1851_s12 = smov 256   ;;  %s1852_s5 = smov 16  }
 0xeea   :  { %1621 = dma.vmem_to_hbm [thread:$0]  %s1616_s29, 2048, %s2530_s7, [#allocation5], %s1851_s12, %s1851_s12, %s1852_s5  }
 0xeeb   :  { %1832 = dma.done.wait [#allocation5], 2048  }
 0xeec   :  { %1833 = vsyncadd [#allocation5], 4294965248 }
 0xeed   :  { %1625 = vsyncpa [#allocation4], 1 }
 0xeee   :  { %1626 = vsyncpa [#allocation5], 1 }

</bundles_post_ra>
